<compile_context>
chip_gen: v5e
topology: v5e:2x2
jax: 0.10.0
libtpu: 0.0.40
codegen_flags: <defaults>
</compile_context>

<pallas_src>
import functools

import jax
import jax.numpy as jnp
from jax.experimental import pallas as pl
from jax.experimental.pallas import tpu as pltpu

_LANE = 128
# Plain Python float (NOT a jax array) so the kernel does not capture a const.
# This finite "minus infinity" is load-bearing: masked lanes flow through
# exp/log/sub below and -inf would produce NaN.
_NEG = -1e30


def _round_up(x, m):
    return ((x + m - 1) // m) * m


# ----------------------------------------------------------------------------
# In-kernel helpers (traced functions on values, not refs)
# ----------------------------------------------------------------------------
def _masked_ce(logits, mask, lane, label_lane, inv_batch):
    """Mean CE of one head living on the lanes where `mask` is True.
    `label_lane` is (B,1) int32 already shifted into padded-lane coords."""
    x = jnp.where(mask, logits, _NEG)
    m = jnp.max(x, axis=-1, keepdims=True)
    e = jnp.where(mask, jnp.exp(x - m), 0.0)
    lse = jnp.log(jnp.sum(e, axis=-1, keepdims=True)) + m            # (B,1)
    onehot = (lane == label_lane).astype(jnp.float32)
    picked = jnp.sum(onehot * logits, axis=-1, keepdims=True)        # (B,1)
    return jnp.sum(lse - picked, axis=(0, 1), keepdims=True) * inv_batch  # (1,1)


def _masked_log_softmax(x, mask):
    xm = jnp.where(mask, x, _NEG)
    m = jnp.max(xm, axis=-1, keepdims=True)
    e = jnp.where(mask, jnp.exp(xm - m), 0.0)
    return xm - m - jnp.log(jnp.sum(e, axis=-1, keepdims=True))


def _emit_lane_dense(losses, width):
    """Pack the three (1,1) losses into one lane-dense (1,width) slab."""
    out_lane = jax.lax.broadcasted_iota(jnp.int32, (1, width), 1)
    out = jnp.zeros((1, width), jnp.float32)
    for h, l in enumerate(losses):
        out = jnp.where(out_lane == h, l, out)
    return out


# ----------------------------------------------------------------------------
# Fused kernel: teacher matmul + all six losses + alpha mixing
# ----------------------------------------------------------------------------
def _fused_distill_kernel(x_ref, w_ref, b_ref, s_cls_ref, s_kd_ref, lab_ref,
                          out_ref, acc_ref, *,
                          offsets, sizes, tau, alpha, distill_type, inv_batch):
    k = pl.program_id(0)

    # -- teacher linear: (optionally tiled) reduction over features on the MXU
    @pl.when(k == 0)
    def _init():
        acc_ref[...] = jnp.zeros_like(acc_ref)

    x_bf = x_ref[...].astype(jnp.bfloat16)              # cast per tile (VPU)
    acc_ref[...] += jnp.dot(x_bf, w_ref[...],
                            preferred_element_type=jnp.float32)

    # -- epilogue on the last K tile: all losses computed in VMEM (f32 math) --
    @pl.when(k == pl.num_programs(0) - 1)
    def _epilogue():
        teacher = acc_ref[...] + b_ref[...]          # (B,CP) f32 teacher logits
        s_cls = s_cls_ref[...]                       # (B,CP) f32
        s_kd = s_kd_ref[...]                         # (B,CP) f32
        labels = lab_ref[...]                        # (B,3)  i32
        bsz, cp = s_cls.shape
        lane = jax.lax.broadcasted_iota(jnp.int32, (bsz, cp), 1)

        inv_tau = 1.0 / tau
        losses = []
        for h in range(3):
            off, n = offsets[h], sizes[h]
            mask = (lane >= off) & (lane < off + n)

            # base criterion: CE(student class-token head, label)
            base = _masked_ce(s_cls, mask, lane, labels[:, h:h + 1] + off,
                              inv_batch)

            if distill_type == "soft":
                ls = _masked_log_softmax(s_kd * inv_tau, mask)
                lt = _masked_log_softmax(teacher * inv_tau, mask)
                pt = jnp.where(mask, jnp.exp(lt), 0.0)
                kl = jnp.sum(jnp.where(mask, pt * (lt - ls), 0.0),
                             axis=(0, 1), keepdims=True)
                kd = kl * (tau * tau) * inv_batch / n    # kl_div sum * T^2/numel
            else:  # "hard": CE(student dist-token head, argmax(teacher))
                # NOTE: argmax taken on bf16-MXU-accumulated teacher logits;
                # near-ties may differ from an f32 teacher.
                t_h = jnp.where(mask, teacher, _NEG)
                t_max = jnp.max(t_h, axis=-1, keepdims=True)
                t_arg = jnp.min(jnp.where(t_h >= t_max, lane, cp),
                                axis=-1, keepdims=True)  # argmax, padded coords
                kd = _masked_ce(s_kd, mask, lane, t_arg, inv_batch)

            losses.append(base * (1.0 - alpha) + kd * alpha)

        out_ref[...] = _emit_lane_dense(losses, _LANE)


# CE-only kernel for distillation_type == "none" (teacher never evaluated,
# matching the PyTorch early return).
def _base_ce_kernel(s_cls_ref, lab_ref, out_ref, *, offsets, sizes, inv_batch):
    s_cls = s_cls_ref[...]
    labels = lab_ref[...]
    bsz, cp = s_cls.shape
    lane = jax.lax.broadcasted_iota(jnp.int32, (bsz, cp), 1)
    losses = []
    for h in range(3):
        off, n = offsets[h], sizes[h]
        mask = (lane >= off) & (lane < off + n)
        losses.append(_masked_ce(s_cls, mask, lane, labels[:, h:h + 1] + off,
                                 inv_batch))
    out_ref[...] = _emit_lane_dense(losses, _LANE)


# ----------------------------------------------------------------------------
# pallas_call wrappers
# ----------------------------------------------------------------------------
_VMEM = pl.BlockSpec(memory_space=pltpu.MemorySpace.VMEM)


def _fused_distill_call(x, w_pad, b_pad, s_cls, s_kd, labels, *,
                        offsets, sizes, tau, alpha, distill_type, tk):
    bsz, d_pad = x.shape
    cp = w_pad.shape[1]
    num_k = d_pad // tk
    kernel = functools.partial(
        _fused_distill_kernel, offsets=offsets, sizes=sizes, tau=tau,
        alpha=alpha, distill_type=distill_type, inv_batch=1.0 / bsz)

    cost = pl.CostEstimate(
        flops=2 * bsz * d_pad * cp,
        transcendentals=16 * bsz * cp,
        bytes_accessed=(x.size * 4 + w_pad.size * 2 + b_pad.size * 4
                        + s_cls.size * 4 + s_kd.size * 4 + labels.size * 4
                        + _LANE * 4))

    return pl.pallas_call(
        kernel,
        out_shape=jax.ShapeDtypeStruct((1, _LANE), jnp.float32),
        grid_spec=pltpu.PrefetchScalarGridSpec(
            num_scalar_prefetch=0,
            grid=(num_k,),
            in_specs=[
                pl.BlockSpec((bsz, tk), lambda k: (0, k)),   # x tile (f32)
                pl.BlockSpec((tk, cp), lambda k: (k, 0)),    # W tile (bf16, 16)
                pl.BlockSpec((1, cp), lambda k: (0, 0)),     # bias (resident)
                pl.BlockSpec((bsz, cp), lambda k: (0, 0)),   # student cls slab
                pl.BlockSpec((bsz, cp), lambda k: (0, 0)),   # student kd slab
                pl.BlockSpec((bsz, 3), lambda k: (0, 0)),    # labels
            ],
            out_specs=pl.BlockSpec((1, _LANE), lambda k: (0, 0)),
            scratch_shapes=[pltpu.VMEM((bsz, cp), jnp.float32)],
        ),
        compiler_params=pltpu.CompilerParams(
            dimension_semantics=("arbitrary",),     # single reduction axis
            vmem_limit_bytes=32 * 1024 * 1024),
        cost_estimate=cost,
    )(x, w_pad, b_pad, s_cls, s_kd, labels)


def _base_ce_call(s_cls, labels, *, offsets, sizes):
    bsz = s_cls.shape[0]
    kernel = functools.partial(_base_ce_kernel, offsets=offsets, sizes=sizes,
                               inv_batch=1.0 / bsz)
    return pl.pallas_call(
        kernel,
        out_shape=jax.ShapeDtypeStruct((1, _LANE), jnp.float32),
        in_specs=[_VMEM, _VMEM],
        out_specs=_VMEM,
    )(s_cls, labels)


# ----------------------------------------------------------------------------
# DistillationLoss module (JAX / Pallas version)
# ----------------------------------------------------------------------------
class DistillationLoss:
    """Mirrors the PyTorch DistillationLoss: three mean-CE base criteria, a
    frozen linear teacher over the flattened input, and soft/hard/none KD."""

    def __init__(self, teacher_params, num_classes, distillation_type, alpha, tau):
        assert distillation_type in ("none", "soft", "hard")
        self.num_classes = tuple(int(n) for n in num_classes)
        self.offsets = (0, self.num_classes[0],
                        self.num_classes[0] + self.num_classes[1])
        ctot = sum(self.num_classes)
        self._cp = _round_up(ctot, 16)           # trimmed class-axis padding
        assert self._cp <= _LANE
        self.distillation_type = distillation_type
        self.alpha = float(alpha)
        self.tau = float(tau)

        w, b = teacher_params                    # W: (D, Ctot), b: (Ctot,)/(1,Ctot)
        d = int(w.shape[0])
        assert int(w.shape[1]) == ctot
        self._d = d

        # Feature-axis tiling.  Small D: one resident grid step.  Large D:
        # K-tiled with per-step bytes big enough to amortise the ~0.35 us grid
        # step overhead on v5e/v6e/v7x; prefer a tile dividing the 128-aligned
        # D so the wrapper never has to pad-copy x.
        if d <= 16384:
            self._d_pad = _round_up(d, 128)
            self._tk = self._d_pad
        else:
            d128 = _round_up(d, 128)
            tk = max((t for t in range(8192, 127, -128) if d128 % t == 0),
                     default=128)
            if tk >= 2048:
                self._tk, self._d_pad = tk, d128
            else:
                self._tk, self._d_pad = 8192, _round_up(d, 8192)

        # Pad ONCE at init: class axis trimmed to 16 (not 128), bf16 weights
        # for the MXU -> ~8x less HBM streamed per call than a 128-lane W.
        # TODO(synk): on v7x the frozen W could be stored fp8 for another 2x.
        self._w_pad = jnp.pad(
            jnp.asarray(w, jnp.float32),
            ((0, self._d_pad - d), (0, self._cp - ctot))).astype(jnp.bfloat16)
        self._b_pad = jnp.pad(jnp.reshape(jnp.asarray(b, jnp.float32), (1, -1)),
                              ((0, 0), (0, self._cp - ctot)))

    # glue: pack the three (B, n_i) heads into one (B, CP) slab (CP = 16)
    def _pack_heads(self, heads):
        cat = jnp.concatenate([h.astype(jnp.float32) for h in heads], axis=1)
        return jnp.pad(cat, ((0, 0), (0, self._cp - cat.shape[1])))

    def _pack_labels(self, labels):
        return jnp.stack([labels["daily_label"], labels["gender_label"],
                          labels["embel_label"]], axis=1).astype(jnp.int32)

    def __call__(self, inputs, outputs, labels):
        outputs_kd = None
        if isinstance(outputs, tuple) and isinstance(outputs[0], tuple):
            outputs, outputs_kd = outputs

        s_cls = self._pack_heads(outputs)
        lab = self._pack_labels(labels)

        if self.distillation_type == "none":
            out = _base_ce_call(s_cls, lab, offsets=self.offsets,
                                sizes=self.num_classes)
            return (out[0, 0], out[0, 1], out[0, 2])

        if outputs_kd is None:
            raise ValueError(
                "When knowledge distillation is enabled, the model is expected "
                "to return a Tuple[Tensor, Tensor] with the output of the "
                "class_token and the dist_token.")

        s_kd = self._pack_heads(outputs_kd)
        bsz = s_cls.shape[0]
        x = inputs.reshape(bsz, -1).astype(jnp.float32)    # NCHW flatten, f32
        if self._d_pad != self._d:                          # usually a no-op
            x = jnp.pad(x, ((0, 0), (0, self._d_pad - self._d)))

        # Teacher is frozen; stop_gradient mimics torch.no_grad().
        # TODO(synk): forward-only — no custom VJP is defined for the kernel.
        out = _fused_distill_call(
            x,
            jax.lax.stop_gradient(self._w_pad),
            jax.lax.stop_gradient(self._b_pad),
            s_cls, s_kd, lab,
            offsets=self.offsets, sizes=self.num_classes,
            tau=self.tau, alpha=self.alpha,
            distill_type=self.distillation_type, tk=self._tk)
        return (out[0, 0], out[0, 1], out[0, 2])


# ----------------------------------------------------------------------------
# Pure-JAX reference (for correctness check)
# ----------------------------------------------------------------------------
def _ref_ce(logits, labels):
    ls = jax.nn.log_softmax(logits.astype(jnp.float32), axis=-1)
    return -jnp.mean(jnp.take_along_axis(ls, labels[:, None].astype(jnp.int32),
                                         axis=1))


def _ref_soft_kd(s, t, tau):
    ls = jax.nn.log_softmax(s.astype(jnp.float32) / tau, axis=-1)
    lt = jax.nn.log_softmax(t.astype(jnp.float32) / tau, axis=-1)
    return jnp.sum(jnp.exp(lt) * (lt - ls)) * (tau * tau) / s.size


# ----------------------------------------------------------------------------
# Main
# ----------------------------------------------------------------------------
if __name__ == "__main__":
    key = jax.random.PRNGKey(0)
    B, C, H, W = 8, 4, 16, 16
    D = C * H * W
    num_classes = (6, 5, 3)          # (daily, gender, embel)
    Ctot = sum(num_classes)
    alpha, tau = 0.5, 2.0

    keys = jax.random.split(key, 12)
    inputs = jax.random.normal(keys[0], (B, C, H, W), jnp.float32)   # NCHW

    out_cls = tuple(jax.random.normal(keys[1 + i], (B, num_classes[i]), jnp.float32)
                    for i in range(3))
    out_kd = tuple(jax.random.normal(keys[4 + i], (B, num_classes[i]), jnp.float32)
                   for i in range(3))
    outputs = (out_cls, out_kd)

    labels = {
        "daily_label": jax.random.randint(keys[7], (B,), 0, num_classes[0]),
        "gender_label": jax.random.randint(keys[8], (B,), 0, num_classes[1]),
        "embel_label": jax.random.randint(keys[9], (B,), 0, num_classes[2]),
    }

    teacher_w = 0.02 * jax.random.normal(keys[10], (D, Ctot), jnp.float32)
    teacher_b = 0.01 * jax.random.normal(keys[11], (1, Ctot), jnp.float32)

    # Pure-JAX reference teacher logits using the same bf16-rounded operands
    # the kernel feeds the MXU (f32 accumulation), so only accumulation-order
    # noise remains.
    x_flat = inputs.reshape(B, -1)
    xb = x_flat.astype(jnp.bfloat16).astype(jnp.float32)
    wb = teacher_w.astype(jnp.bfloat16).astype(jnp.float32)
    t_all = jnp.dot(xb, wb, precision=jax.lax.Precision.HIGHEST) \
        + teacher_b.reshape(1, -1)
    offs = (0, num_classes[0], num_classes[0] + num_classes[1])
    t_heads = tuple(t_all[:, offs[i]:offs[i] + num_classes[i]] for i in range(3))
    label_keys = ("daily_label", "gender_label", "embel_label")

    # --- soft distillation ---------------------------------------------------
    crit_soft = DistillationLoss((teacher_w, teacher_b), num_classes, "soft",
                                 alpha, tau)
    got_soft = jax.block_until_ready(crit_soft(inputs, outputs, labels))
    ref_soft = tuple(
        _ref_ce(out_cls[i], labels[label_keys[i]]) * (1 - alpha)
        + _ref_soft_kd(out_kd[i], t_heads[i], tau) * alpha
        for i in range(3))
    for g, r in zip(got_soft, ref_soft):
        assert jnp.allclose(g, r, rtol=2e-3, atol=1e-4), (g, r)

    # --- hard distillation ---------------------------------------------------
    crit_hard = DistillationLoss((teacher_w, teacher_b), num_classes, "hard",
                                 alpha, tau)
    got_hard = jax.block_until_ready(crit_hard(inputs, outputs, labels))
    ref_hard = tuple(
        _ref_ce(out_cls[i], labels[label_keys[i]]) * (1 - alpha)
        + _ref_ce(out_kd[i], jnp.argmax(t_heads[i], axis=1)) * alpha
        for i in range(3))
    for g, r in zip(got_hard, ref_hard):
        assert jnp.allclose(g, r, rtol=2e-3, atol=1e-4), (g, r)

    # --- no distillation -----------------------------------------------------
    crit_none = DistillationLoss((teacher_w, teacher_b), num_classes, "none",
                                 alpha, tau)
    got_none = jax.block_until_ready(crit_none(inputs, outputs, labels))
    ref_none = tuple(_ref_ce(out_cls[i], labels[label_keys[i]]) for i in range(3))
    for g, r in zip(got_none, ref_none):
        assert jnp.allclose(g, r, rtol=2e-3, atol=1e-4), (g, r)

    print("KERNEL_OK")
</pallas_src>

<mosaic_0001>
module attributes {stable_mosaic.version = 11 : i64} {
  func.func @_fused_distill_kernel(%arg0: i32, %arg1: memref<8x1024xf32, #tpu.memory_space<vmem>>, %arg2: memref<1024x16xbf16, #tpu.memory_space<vmem>>, %arg3: memref<1x16xf32, #tpu.memory_space<vmem>>, %arg4: memref<8x16xf32, #tpu.memory_space<vmem>>, %arg5: memref<8x16xf32, #tpu.memory_space<vmem>>, %arg6: memref<8x3xi32, #tpu.memory_space<vmem>>, %arg7: memref<1x128xf32, #tpu.memory_space<vmem>>, %arg8: memref<8x16xf32, #tpu.memory_space<vmem>>) attributes {dimension_semantics = [#tpu.dimension_semantics<arbitrary>], iteration_bounds = array<i64: 1>, scalar_prefetch = 0 : i64, scratch_operands = 1 : i64, tpu.core_type = #tpu.core_type<tc>, window_params = [{transform_indices = @transform_0, window_bounds = array<i64: 8, 1024>}, {transform_indices = @transform_1, window_bounds = array<i64: 1024, 16>}, {pipeline_mode = #tpu.pipeline_mode<synchronous>, transform_indices = @transform_2, window_bounds = array<i64: 1, 16>}, {pipeline_mode = #tpu.pipeline_mode<synchronous>, transform_indices = @transform_3, window_bounds = array<i64: 8, 16>}, {pipeline_mode = #tpu.pipeline_mode<synchronous>, transform_indices = @transform_4, window_bounds = array<i64: 8, 16>}, {pipeline_mode = #tpu.pipeline_mode<synchronous>, transform_indices = @transform_5, window_bounds = array<i64: 8, 3>}, {pipeline_mode = #tpu.pipeline_mode<synchronous>, transform_indices = @transform_6, window_bounds = array<i64: 1, 128>}]} {
    %c0_i32 = arith.constant 0 : i32
    %0 = arith.cmpi eq, %arg0, %c0_i32 : i32
    %1 = arith.extui %0 : i1 to i32
    %c0_i32_0 = arith.constant 0 : i32
    %2 = arith.cmpi ne, %1, %c0_i32_0 : i32
    scf.if %2 {
      %cst_10 = arith.constant 0.000000e+00 : f32
      %13 = vector.broadcast %cst_10 : f32 to vector<8x16xf32>
      %c0_11 = arith.constant 0 : index
      %c0_12 = arith.constant 0 : index
      %14 = vector.load %arg8[%c0_11, %c0_12] : memref<8x16xf32, #tpu.memory_space<vmem>>, vector<8x16xf32>
      tpu.vector_store %arg8[%c0_11, %c0_12], %13 {strides = array<i32>} : memref<8x16xf32, #tpu.memory_space<vmem>>, vector<8x16xf32>,
    } else {
    }
    %c0 = arith.constant 0 : index
    %c0_1 = arith.constant 0 : index
    %3 = vector.load %arg1[%c0, %c0_1] : memref<8x1024xf32, #tpu.memory_space<vmem>>, vector<8x1024xf32>
    %4 = arith.truncf %3 : vector<8x1024xf32> to vector<8x1024xbf16>
    %c0_2 = arith.constant 0 : index
    %c0_3 = arith.constant 0 : index
    %5 = vector.load %arg8[%c0_2, %c0_3] : memref<8x16xf32, #tpu.memory_space<vmem>>, vector<8x16xf32>
    %c0_4 = arith.constant 0 : index
    %c0_5 = arith.constant 0 : index
    %6 = vector.load %arg2[%c0_4, %c0_5] : memref<1024x16xbf16, #tpu.memory_space<vmem>>, vector<1024x16xbf16>
    %cst = arith.constant dense<0.000000e+00> : vector<8x16xf32>
    %7 = tpu.matmul %4, %6, %cst {dimension_numbers = #tpu.dot_dimension_numbers<[1], [0], [0], [1], [0, 0, 1, 1], [], []>} : vector<8x1024xbf16>, vector<1024x16xbf16>, vector<8x16xf32> -> vector<8x16xf32>
    %8 = arith.addf %5, %7 : vector<8x16xf32>
    %c0_6 = arith.constant 0 : index
    %c0_7 = arith.constant 0 : index
    %9 = vector.load %arg8[%c0_6, %c0_7] : memref<8x16xf32, #tpu.memory_space<vmem>>, vector<8x16xf32>
    tpu.vector_store %arg8[%c0_6, %c0_7], %8 {strides = array<i32>} : memref<8x16xf32, #tpu.memory_space<vmem>>, vector<8x16xf32>,
    %c0_i32_8 = arith.constant 0 : i32
    %10 = arith.cmpi eq, %arg0, %c0_i32_8 : i32
    %11 = arith.extui %10 : i1 to i32
    %c0_i32_9 = arith.constant 0 : i32
    %12 = arith.cmpi ne, %11, %c0_i32_9 : i32
    scf.if %12 {
      %c0_10 = arith.constant 0 : index
      %c0_11 = arith.constant 0 : index
      %13 = vector.load %arg8[%c0_10, %c0_11] : memref<8x16xf32, #tpu.memory_space<vmem>>, vector<8x16xf32>
      %c0_12 = arith.constant 0 : index
      %c0_13 = arith.constant 0 : index
      %14 = vector.load %arg3[%c0_12, %c0_13] : memref<1x16xf32, #tpu.memory_space<vmem>>, vector<1x16xf32>
      %15 = vector.broadcast %14 : vector<1x16xf32> to vector<8x16xf32>
      %16 = arith.addf %13, %15 : vector<8x16xf32>
      %c0_14 = arith.constant 0 : index
      %c0_15 = arith.constant 0 : index
      %17 = vector.load %arg4[%c0_14, %c0_15] : memref<8x16xf32, #tpu.memory_space<vmem>>, vector<8x16xf32>
      %c0_16 = arith.constant 0 : index
      %c0_17 = arith.constant 0 : index
      %18 = vector.load %arg5[%c0_16, %c0_17] : memref<8x16xf32, #tpu.memory_space<vmem>>, vector<8x16xf32>
      %c0_18 = arith.constant 0 : index
      %c0_19 = arith.constant 0 : index
      %19 = vector.load %arg6[%c0_18, %c0_19] : memref<8x3xi32, #tpu.memory_space<vmem>>, vector<8x3xi32>
      %20 = tpu.iota {dimensions = array<i32: 1>} : vector<8x16xi32>
      %c0_i32_20 = arith.constant 0 : i32
      %21 = vector.broadcast %c0_i32_20 : i32 to vector<8x16xi32>
      %22 = arith.cmpi sge, %20, %21 : vector<8x16xi32>
      %c6_i32 = arith.constant 6 : i32
      %23 = vector.broadcast %c6_i32 : i32 to vector<8x16xi32>
      %24 = arith.cmpi slt, %20, %23 : vector<8x16xi32>
      %25 = arith.andi %22, %24 : vector<8x16xi1>
      %26 = vector.extract_strided_slice %19 {offsets = [0, 0], sizes = [8, 1], strides = [1, 1]} : vector<8x3xi32> to vector<8x1xi32>
      %c0_i32_21 = arith.constant 0 : i32
      %27 = vector.broadcast %c0_i32_21 : i32 to vector<8x1xi32>
      %28 = arith.addi %26, %27 : vector<8x1xi32>
      %cst_22 = arith.constant -1.000000e+30 : f32
      %29 = vector.broadcast %cst_22 : f32 to vector<8x16xf32>
      %30 = arith.select %25, %17, %29 : vector<8x16xi1>, vector<8x16xf32>
      %cst_23 = arith.constant dense<0xFF800000> : vector<8xf32>
      %31 = vector.multi_reduction <maximumf>, %30, %cst_23 [1] : vector<8x16xf32> to vector<8xf32>
      %32 = vector.shape_cast %31 : vector<8xf32> to vector<8x1xf32>
      %33 = vector.broadcast %32 : vector<8x1xf32> to vector<8x16xf32>
      %34 = arith.subf %30, %33 : vector<8x16xf32>
      %35 = math.exp %34 : vector<8x16xf32>
      %cst_24 = arith.constant 0.000000e+00 : f32
      %36 = vector.broadcast %cst_24 : f32 to vector<8x16xf32>
      %37 = arith.select %25, %35, %36 : vector<8x16xi1>, vector<8x16xf32>
      %cst_25 = arith.constant dense<0.000000e+00> : vector<8xf32>
      %38 = vector.multi_reduction <add>, %37, %cst_25 [1] : vector<8x16xf32> to vector<8xf32>
      %39 = vector.shape_cast %38 : vector<8xf32> to vector<8x1xf32>
      %40 = math.log %39 : vector<8x1xf32>
      %41 = arith.addf %40, %32 : vector<8x1xf32>
      %42 = vector.broadcast %28 : vector<8x1xi32> to vector<8x16xi32>
      %43 = arith.cmpi eq, %20, %42 : vector<8x16xi32>
      %44 = arith.extui %43 : vector<8x16xi1> to vector<8x16xi32>
      %45 = arith.sitofp %44 : vector<8x16xi32> to vector<8x16xf32>
      %46 = arith.mulf %45, %17 : vector<8x16xf32>
      %cst_26 = arith.constant dense<0.000000e+00> : vector<8xf32>
      %47 = vector.multi_reduction <add>, %46, %cst_26 [1] : vector<8x16xf32> to vector<8xf32>
      %48 = vector.shape_cast %47 : vector<8xf32> to vector<8x1xf32>
      %49 = arith.subf %41, %48 : vector<8x1xf32>
      %50 = vector.shape_cast %49 : vector<8x1xf32> to vector<1x8x1xf32>
      %cst_27 = arith.constant dense<0.000000e+00> : vector<1xf32>
      %51 = vector.multi_reduction <add>, %50, %cst_27 [1, 2] : vector<1x8x1xf32> to vector<1xf32>
      %52 = vector.shape_cast %51 : vector<1xf32> to vector<1x1x1xf32>
      %53 = vector.extract %52[0, 0, 0] : f32 from vector<1x1x1xf32>
      %54 = vector.broadcast %53 : f32 to vector<1x1xf32>
      %cst_28 = arith.constant 1.250000e-01 : f32
      %55 = vector.broadcast %cst_28 : f32 to vector<1x1xf32>
      %56 = arith.mulf %54, %55 : vector<1x1xf32>
      %cst_29 = arith.constant 5.000000e-01 : f32
      %57 = vector.broadcast %cst_29 : f32 to vector<8x16xf32>
      %58 = arith.mulf %18, %57 : vector<8x16xf32>
      %cst_30 = arith.constant -1.000000e+30 : f32
      %59 = vector.broadcast %cst_30 : f32 to vector<8x16xf32>
      %60 = arith.select %25, %58, %59 : vector<8x16xi1>, vector<8x16xf32>
      %cst_31 = arith.constant dense<0xFF800000> : vector<8xf32>
      %61 = vector.multi_reduction <maximumf>, %60, %cst_31 [1] : vector<8x16xf32> to vector<8xf32>
      %62 = vector.shape_cast %61 : vector<8xf32> to vector<8x1xf32>
      %63 = vector.broadcast %62 : vector<8x1xf32> to vector<8x16xf32>
      %64 = arith.subf %60, %63 : vector<8x16xf32>
      %65 = math.exp %64 : vector<8x16xf32>
      %cst_32 = arith.constant 0.000000e+00 : f32
      %66 = vector.broadcast %cst_32 : f32 to vector<8x16xf32>
      %67 = arith.select %25, %65, %66 : vector<8x16xi1>, vector<8x16xf32>
      %68 = vector.broadcast %62 : vector<8x1xf32> to vector<8x16xf32>
      %69 = arith.subf %60, %68 : vector<8x16xf32>
      %cst_33 = arith.constant dense<0.000000e+00> : vector<8xf32>
      %70 = vector.multi_reduction <add>, %67, %cst_33 [1] : vector<8x16xf32> to vector<8xf32>
      %71 = vector.shape_cast %70 : vector<8xf32> to vector<8x1xf32>
      %72 = math.log %71 : vector<8x1xf32>
      %73 = vector.broadcast %72 : vector<8x1xf32> to vector<8x16xf32>
      %74 = arith.subf %69, %73 : vector<8x16xf32>
      %cst_34 = arith.constant 5.000000e-01 : f32
      %75 = vector.broadcast %cst_34 : f32 to vector<8x16xf32>
      %76 = arith.mulf %16, %75 : vector<8x16xf32>
      %cst_35 = arith.constant -1.000000e+30 : f32
      %77 = vector.broadcast %cst_35 : f32 to vector<8x16xf32>
      %78 = arith.select %25, %76, %77 : vector<8x16xi1>, vector<8x16xf32>
      %cst_36 = arith.constant dense<0xFF800000> : vector<8xf32>
      %79 = vector.multi_reduction <maximumf>, %78, %cst_36 [1] : vector<8x16xf32> to vector<8xf32>
      %80 = vector.shape_cast %79 : vector<8xf32> to vector<8x1xf32>
      %81 = vector.broadcast %80 : vector<8x1xf32> to vector<8x16xf32>
      %82 = arith.subf %78, %81 : vector<8x16xf32>
      %83 = math.exp %82 : vector<8x16xf32>
      %cst_37 = arith.constant 0.000000e+00 : f32
      %84 = vector.broadcast %cst_37 : f32 to vector<8x16xf32>
      %85 = arith.select %25, %83, %84 : vector<8x16xi1>, vector<8x16xf32>
      %86 = vector.broadcast %80 : vector<8x1xf32> to vector<8x16xf32>
      %87 = arith.subf %78, %86 : vector<8x16xf32>
      %cst_38 = arith.constant dense<0.000000e+00> : vector<8xf32>
      %88 = vector.multi_reduction <add>, %85, %cst_38 [1] : vector<8x16xf32> to vector<8xf32>
      %89 = vector.shape_cast %88 : vector<8xf32> to vector<8x1xf32>
      %90 = math.log %89 : vector<8x1xf32>
      %91 = vector.broadcast %90 : vector<8x1xf32> to vector<8x16xf32>
      %92 = arith.subf %87, %91 : vector<8x16xf32>
      %93 = math.exp %92 : vector<8x16xf32>
      %cst_39 = arith.constant 0.000000e+00 : f32
      %94 = vector.broadcast %cst_39 : f32 to vector<8x16xf32>
      %95 = arith.select %25, %93, %94 : vector<8x16xi1>, vector<8x16xf32>
      %96 = arith.subf %92, %74 : vector<8x16xf32>
      %97 = arith.mulf %95, %96 : vector<8x16xf32>
      %cst_40 = arith.constant 0.000000e+00 : f32
      %98 = vector.broadcast %cst_40 : f32 to vector<8x16xf32>
      %99 = arith.select %25, %97, %98 : vector<8x16xi1>, vector<8x16xf32>
      %100 = vector.shape_cast %99 : vector<8x16xf32> to vector<1x8x16xf32>
      %cst_41 = arith.constant dense<0.000000e+00> : vector<1xf32>
      %101 = vector.multi_reduction <add>, %100, %cst_41 [1, 2] : vector<1x8x16xf32> to vector<1xf32>
      %102 = vector.shape_cast %101 : vector<1xf32> to vector<1x1x1xf32>
      %103 = vector.extract %102[0, 0, 0] : f32 from vector<1x1x1xf32>
      %104 = vector.broadcast %103 : f32 to vector<1x1xf32>
      %cst_42 = arith.constant 4.000000e+00 : f32
      %105 = vector.broadcast %cst_42 : f32 to vector<1x1xf32>
      %106 = arith.mulf %104, %105 : vector<1x1xf32>
      %cst_43 = arith.constant 1.250000e-01 : f32
      %107 = vector.broadcast %cst_43 : f32 to vector<1x1xf32>
      %108 = arith.mulf %106, %107 : vector<1x1xf32>
      %cst_44 = arith.constant 6.000000e+00 : f32
      %109 = vector.broadcast %cst_44 : f32 to vector<1x1xf32>
      %110 = arith.divf %108, %109 : vector<1x1xf32>
      %cst_45 = arith.constant 5.000000e-01 : f32
      %111 = vector.broadcast %cst_45 : f32 to vector<1x1xf32>
      %112 = arith.mulf %56, %111 : vector<1x1xf32>
      %cst_46 = arith.constant 5.000000e-01 : f32
      %113 = vector.broadcast %cst_46 : f32 to vector<1x1xf32>
      %114 = arith.mulf %110, %113 : vector<1x1xf32>
      %115 = arith.addf %112, %114 : vector<1x1xf32>
      %c6_i32_47 = arith.constant 6 : i32
      %116 = vector.broadcast %c6_i32_47 : i32 to vector<8x16xi32>
      %117 = arith.cmpi sge, %20, %116 : vector<8x16xi32>
      %c11_i32 = arith.constant 11 : i32
      %118 = vector.broadcast %c11_i32 : i32 to vector<8x16xi32>
      %119 = arith.cmpi slt, %20, %118 : vector<8x16xi32>
      %120 = arith.andi %117, %119 : vector<8x16xi1>
      %121 = vector.extract_strided_slice %19 {offsets = [0, 1], sizes = [8, 1], strides = [1, 1]} : vector<8x3xi32> to vector<8x1xi32>
      %c6_i32_48 = arith.constant 6 : i32
      %122 = vector.broadcast %c6_i32_48 : i32 to vector<8x1xi32>
      %123 = arith.addi %121, %122 : vector<8x1xi32>
      %cst_49 = arith.constant -1.000000e+30 : f32
      %124 = vector.broadcast %cst_49 : f32 to vector<8x16xf32>
      %125 = arith.select %120, %17, %124 : vector<8x16xi1>, vector<8x16xf32>
      %cst_50 = arith.constant dense<0xFF800000> : vector<8xf32>
      %126 = vector.multi_reduction <maximumf>, %125, %cst_50 [1] : vector<8x16xf32> to vector<8xf32>
      %127 = vector.shape_cast %126 : vector<8xf32> to vector<8x1xf32>
      %128 = vector.broadcast %127 : vector<8x1xf32> to vector<8x16xf32>
      %129 = arith.subf %125, %128 : vector<8x16xf32>
      %130 = math.exp %129 : vector<8x16xf32>
      %cst_51 = arith.constant 0.000000e+00 : f32
      %131 = vector.broadcast %cst_51 : f32 to vector<8x16xf32>
      %132 = arith.select %120, %130, %131 : vector<8x16xi1>, vector<8x16xf32>
      %cst_52 = arith.constant dense<0.000000e+00> : vector<8xf32>
      %133 = vector.multi_reduction <add>, %132, %cst_52 [1] : vector<8x16xf32> to vector<8xf32>
      %134 = vector.shape_cast %133 : vector<8xf32> to vector<8x1xf32>
      %135 = math.log %134 : vector<8x1xf32>
      %136 = arith.addf %135, %127 : vector<8x1xf32>
      %137 = vector.broadcast %123 : vector<8x1xi32> to vector<8x16xi32>
      %138 = arith.cmpi eq, %20, %137 : vector<8x16xi32>
      %139 = arith.extui %138 : vector<8x16xi1> to vector<8x16xi32>
      %140 = arith.sitofp %139 : vector<8x16xi32> to vector<8x16xf32>
      %141 = arith.mulf %140, %17 : vector<8x16xf32>
      %cst_53 = arith.constant dense<0.000000e+00> : vector<8xf32>
      %142 = vector.multi_reduction <add>, %141, %cst_53 [1] : vector<8x16xf32> to vector<8xf32>
      %143 = vector.shape_cast %142 : vector<8xf32> to vector<8x1xf32>
      %144 = arith.subf %136, %143 : vector<8x1xf32>
      %145 = vector.shape_cast %144 : vector<8x1xf32> to vector<1x8x1xf32>
      %cst_54 = arith.constant dense<0.000000e+00> : vector<1xf32>
      %146 = vector.multi_reduction <add>, %145, %cst_54 [1, 2] : vector<1x8x1xf32> to vector<1xf32>
      %147 = vector.shape_cast %146 : vector<1xf32> to vector<1x1x1xf32>
      %148 = vector.extract %147[0, 0, 0] : f32 from vector<1x1x1xf32>
      %149 = vector.broadcast %148 : f32 to vector<1x1xf32>
      %cst_55 = arith.constant 1.250000e-01 : f32
      %150 = vector.broadcast %cst_55 : f32 to vector<1x1xf32>
      %151 = arith.mulf %149, %150 : vector<1x1xf32>
      %cst_56 = arith.constant 5.000000e-01 : f32
      %152 = vector.broadcast %cst_56 : f32 to vector<8x16xf32>
      %153 = arith.mulf %18, %152 : vector<8x16xf32>
      %cst_57 = arith.constant -1.000000e+30 : f32
      %154 = vector.broadcast %cst_57 : f32 to vector<8x16xf32>
      %155 = arith.select %120, %153, %154 : vector<8x16xi1>, vector<8x16xf32>
      %cst_58 = arith.constant dense<0xFF800000> : vector<8xf32>
      %156 = vector.multi_reduction <maximumf>, %155, %cst_58 [1] : vector<8x16xf32> to vector<8xf32>
      %157 = vector.shape_cast %156 : vector<8xf32> to vector<8x1xf32>
      %158 = vector.broadcast %157 : vector<8x1xf32> to vector<8x16xf32>
      %159 = arith.subf %155, %158 : vector<8x16xf32>
      %160 = math.exp %159 : vector<8x16xf32>
      %cst_59 = arith.constant 0.000000e+00 : f32
      %161 = vector.broadcast %cst_59 : f32 to vector<8x16xf32>
      %162 = arith.select %120, %160, %161 : vector<8x16xi1>, vector<8x16xf32>
      %163 = vector.broadcast %157 : vector<8x1xf32> to vector<8x16xf32>
      %164 = arith.subf %155, %163 : vector<8x16xf32>
      %cst_60 = arith.constant dense<0.000000e+00> : vector<8xf32>
      %165 = vector.multi_reduction <add>, %162, %cst_60 [1] : vector<8x16xf32> to vector<8xf32>
      %166 = vector.shape_cast %165 : vector<8xf32> to vector<8x1xf32>
      %167 = math.log %166 : vector<8x1xf32>
      %168 = vector.broadcast %167 : vector<8x1xf32> to vector<8x16xf32>
      %169 = arith.subf %164, %168 : vector<8x16xf32>
      %cst_61 = arith.constant 5.000000e-01 : f32
      %170 = vector.broadcast %cst_61 : f32 to vector<8x16xf32>
      %171 = arith.mulf %16, %170 : vector<8x16xf32>
      %cst_62 = arith.constant -1.000000e+30 : f32
      %172 = vector.broadcast %cst_62 : f32 to vector<8x16xf32>
      %173 = arith.select %120, %171, %172 : vector<8x16xi1>, vector<8x16xf32>
      %cst_63 = arith.constant dense<0xFF800000> : vector<8xf32>
      %174 = vector.multi_reduction <maximumf>, %173, %cst_63 [1] : vector<8x16xf32> to vector<8xf32>
      %175 = vector.shape_cast %174 : vector<8xf32> to vector<8x1xf32>
      %176 = vector.broadcast %175 : vector<8x1xf32> to vector<8x16xf32>
      %177 = arith.subf %173, %176 : vector<8x16xf32>
      %178 = math.exp %177 : vector<8x16xf32>
      %cst_64 = arith.constant 0.000000e+00 : f32
      %179 = vector.broadcast %cst_64 : f32 to vector<8x16xf32>
      %180 = arith.select %120, %178, %179 : vector<8x16xi1>, vector<8x16xf32>
      %181 = vector.broadcast %175 : vector<8x1xf32> to vector<8x16xf32>
      %182 = arith.subf %173, %181 : vector<8x16xf32>
      %cst_65 = arith.constant dense<0.000000e+00> : vector<8xf32>
      %183 = vector.multi_reduction <add>, %180, %cst_65 [1] : vector<8x16xf32> to vector<8xf32>
      %184 = vector.shape_cast %183 : vector<8xf32> to vector<8x1xf32>
      %185 = math.log %184 : vector<8x1xf32>
      %186 = vector.broadcast %185 : vector<8x1xf32> to vector<8x16xf32>
      %187 = arith.subf %182, %186 : vector<8x16xf32>
      %188 = math.exp %187 : vector<8x16xf32>
      %cst_66 = arith.constant 0.000000e+00 : f32
      %189 = vector.broadcast %cst_66 : f32 to vector<8x16xf32>
      %190 = arith.select %120, %188, %189 : vector<8x16xi1>, vector<8x16xf32>
      %191 = arith.subf %187, %169 : vector<8x16xf32>
      %192 = arith.mulf %190, %191 : vector<8x16xf32>
      %cst_67 = arith.constant 0.000000e+00 : f32
      %193 = vector.broadcast %cst_67 : f32 to vector<8x16xf32>
      %194 = arith.select %120, %192, %193 : vector<8x16xi1>, vector<8x16xf32>
      %195 = vector.shape_cast %194 : vector<8x16xf32> to vector<1x8x16xf32>
      %cst_68 = arith.constant dense<0.000000e+00> : vector<1xf32>
      %196 = vector.multi_reduction <add>, %195, %cst_68 [1, 2] : vector<1x8x16xf32> to vector<1xf32>
      %197 = vector.shape_cast %196 : vector<1xf32> to vector<1x1x1xf32>
      %198 = vector.extract %197[0, 0, 0] : f32 from vector<1x1x1xf32>
      %199 = vector.broadcast %198 : f32 to vector<1x1xf32>
      %cst_69 = arith.constant 4.000000e+00 : f32
      %200 = vector.broadcast %cst_69 : f32 to vector<1x1xf32>
      %201 = arith.mulf %199, %200 : vector<1x1xf32>
      %cst_70 = arith.constant 1.250000e-01 : f32
      %202 = vector.broadcast %cst_70 : f32 to vector<1x1xf32>
      %203 = arith.mulf %201, %202 : vector<1x1xf32>
      %cst_71 = arith.constant 5.000000e+00 : f32
      %204 = vector.broadcast %cst_71 : f32 to vector<1x1xf32>
      %205 = arith.divf %203, %204 : vector<1x1xf32>
      %cst_72 = arith.constant 5.000000e-01 : f32
      %206 = vector.broadcast %cst_72 : f32 to vector<1x1xf32>
      %207 = arith.mulf %151, %206 : vector<1x1xf32>
      %cst_73 = arith.constant 5.000000e-01 : f32
      %208 = vector.broadcast %cst_73 : f32 to vector<1x1xf32>
      %209 = arith.mulf %205, %208 : vector<1x1xf32>
      %210 = arith.addf %207, %209 : vector<1x1xf32>
      %c11_i32_74 = arith.constant 11 : i32
      %211 = vector.broadcast %c11_i32_74 : i32 to vector<8x16xi32>
      %212 = arith.cmpi sge, %20, %211 : vector<8x16xi32>
      %c14_i32 = arith.constant 14 : i32
      %213 = vector.broadcast %c14_i32 : i32 to vector<8x16xi32>
      %214 = arith.cmpi slt, %20, %213 : vector<8x16xi32>
      %215 = arith.andi %212, %214 : vector<8x16xi1>
      %216 = vector.extract_strided_slice %19 {offsets = [0, 2], sizes = [8, 1], strides = [1, 1]} : vector<8x3xi32> to vector<8x1xi32>
      %c11_i32_75 = arith.constant 11 : i32
      %217 = vector.broadcast %c11_i32_75 : i32 to vector<8x1xi32>
      %218 = arith.addi %216, %217 : vector<8x1xi32>
      %cst_76 = arith.constant -1.000000e+30 : f32
      %219 = vector.broadcast %cst_76 : f32 to vector<8x16xf32>
      %220 = arith.select %215, %17, %219 : vector<8x16xi1>, vector<8x16xf32>
      %cst_77 = arith.constant dense<0xFF800000> : vector<8xf32>
      %221 = vector.multi_reduction <maximumf>, %220, %cst_77 [1] : vector<8x16xf32> to vector<8xf32>
      %222 = vector.shape_cast %221 : vector<8xf32> to vector<8x1xf32>
      %223 = vector.broadcast %222 : vector<8x1xf32> to vector<8x16xf32>
      %224 = arith.subf %220, %223 : vector<8x16xf32>
      %225 = math.exp %224 : vector<8x16xf32>
      %cst_78 = arith.constant 0.000000e+00 : f32
      %226 = vector.broadcast %cst_78 : f32 to vector<8x16xf32>
      %227 = arith.select %215, %225, %226 : vector<8x16xi1>, vector<8x16xf32>
      %cst_79 = arith.constant dense<0.000000e+00> : vector<8xf32>
      %228 = vector.multi_reduction <add>, %227, %cst_79 [1] : vector<8x16xf32> to vector<8xf32>
      %229 = vector.shape_cast %228 : vector<8xf32> to vector<8x1xf32>
      %230 = math.log %229 : vector<8x1xf32>
      %231 = arith.addf %230, %222 : vector<8x1xf32>
      %232 = vector.broadcast %218 : vector<8x1xi32> to vector<8x16xi32>
      %233 = arith.cmpi eq, %20, %232 : vector<8x16xi32>
      %234 = arith.extui %233 : vector<8x16xi1> to vector<8x16xi32>
      %235 = arith.sitofp %234 : vector<8x16xi32> to vector<8x16xf32>
      %236 = arith.mulf %235, %17 : vector<8x16xf32>
      %cst_80 = arith.constant dense<0.000000e+00> : vector<8xf32>
      %237 = vector.multi_reduction <add>, %236, %cst_80 [1] : vector<8x16xf32> to vector<8xf32>
      %238 = vector.shape_cast %237 : vector<8xf32> to vector<8x1xf32>
      %239 = arith.subf %231, %238 : vector<8x1xf32>
      %240 = vector.shape_cast %239 : vector<8x1xf32> to vector<1x8x1xf32>
      %cst_81 = arith.constant dense<0.000000e+00> : vector<1xf32>
      %241 = vector.multi_reduction <add>, %240, %cst_81 [1, 2] : vector<1x8x1xf32> to vector<1xf32>
      %242 = vector.shape_cast %241 : vector<1xf32> to vector<1x1x1xf32>
      %243 = vector.extract %242[0, 0, 0] : f32 from vector<1x1x1xf32>
      %244 = vector.broadcast %243 : f32 to vector<1x1xf32>
      %cst_82 = arith.constant 1.250000e-01 : f32
      %245 = vector.broadcast %cst_82 : f32 to vector<1x1xf32>
      %246 = arith.mulf %244, %245 : vector<1x1xf32>
      %cst_83 = arith.constant 5.000000e-01 : f32
      %247 = vector.broadcast %cst_83 : f32 to vector<8x16xf32>
      %248 = arith.mulf %18, %247 : vector<8x16xf32>
      %cst_84 = arith.constant -1.000000e+30 : f32
      %249 = vector.broadcast %cst_84 : f32 to vector<8x16xf32>
      %250 = arith.select %215, %248, %249 : vector<8x16xi1>, vector<8x16xf32>
      %cst_85 = arith.constant dense<0xFF800000> : vector<8xf32>
      %251 = vector.multi_reduction <maximumf>, %250, %cst_85 [1] : vector<8x16xf32> to vector<8xf32>
      %252 = vector.shape_cast %251 : vector<8xf32> to vector<8x1xf32>
      %253 = vector.broadcast %252 : vector<8x1xf32> to vector<8x16xf32>
      %254 = arith.subf %250, %253 : vector<8x16xf32>
      %255 = math.exp %254 : vector<8x16xf32>
      %cst_86 = arith.constant 0.000000e+00 : f32
      %256 = vector.broadcast %cst_86 : f32 to vector<8x16xf32>
      %257 = arith.select %215, %255, %256 : vector<8x16xi1>, vector<8x16xf32>
      %258 = vector.broadcast %252 : vector<8x1xf32> to vector<8x16xf32>
      %259 = arith.subf %250, %258 : vector<8x16xf32>
      %cst_87 = arith.constant dense<0.000000e+00> : vector<8xf32>
      %260 = vector.multi_reduction <add>, %257, %cst_87 [1] : vector<8x16xf32> to vector<8xf32>
      %261 = vector.shape_cast %260 : vector<8xf32> to vector<8x1xf32>
      %262 = math.log %261 : vector<8x1xf32>
      %263 = vector.broadcast %262 : vector<8x1xf32> to vector<8x16xf32>
      %264 = arith.subf %259, %263 : vector<8x16xf32>
      %cst_88 = arith.constant 5.000000e-01 : f32
      %265 = vector.broadcast %cst_88 : f32 to vector<8x16xf32>
      %266 = arith.mulf %16, %265 : vector<8x16xf32>
      %cst_89 = arith.constant -1.000000e+30 : f32
      %267 = vector.broadcast %cst_89 : f32 to vector<8x16xf32>
      %268 = arith.select %215, %266, %267 : vector<8x16xi1>, vector<8x16xf32>
      %cst_90 = arith.constant dense<0xFF800000> : vector<8xf32>
      %269 = vector.multi_reduction <maximumf>, %268, %cst_90 [1] : vector<8x16xf32> to vector<8xf32>
      %270 = vector.shape_cast %269 : vector<8xf32> to vector<8x1xf32>
      %271 = vector.broadcast %270 : vector<8x1xf32> to vector<8x16xf32>
      %272 = arith.subf %268, %271 : vector<8x16xf32>
      %273 = math.exp %272 : vector<8x16xf32>
      %cst_91 = arith.constant 0.000000e+00 : f32
      %274 = vector.broadcast %cst_91 : f32 to vector<8x16xf32>
      %275 = arith.select %215, %273, %274 : vector<8x16xi1>, vector<8x16xf32>
      %276 = vector.broadcast %270 : vector<8x1xf32> to vector<8x16xf32>
      %277 = arith.subf %268, %276 : vector<8x16xf32>
      %cst_92 = arith.constant dense<0.000000e+00> : vector<8xf32>
      %278 = vector.multi_reduction <add>, %275, %cst_92 [1] : vector<8x16xf32> to vector<8xf32>
      %279 = vector.shape_cast %278 : vector<8xf32> to vector<8x1xf32>
      %280 = math.log %279 : vector<8x1xf32>
      %281 = vector.broadcast %280 : vector<8x1xf32> to vector<8x16xf32>
      %282 = arith.subf %277, %281 : vector<8x16xf32>
      %283 = math.exp %282 : vector<8x16xf32>
      %cst_93 = arith.constant 0.000000e+00 : f32
      %284 = vector.broadcast %cst_93 : f32 to vector<8x16xf32>
      %285 = arith.select %215, %283, %284 : vector<8x16xi1>, vector<8x16xf32>
      %286 = arith.subf %282, %264 : vector<8x16xf32>
      %287 = arith.mulf %285, %286 : vector<8x16xf32>
      %cst_94 = arith.constant 0.000000e+00 : f32
      %288 = vector.broadcast %cst_94 : f32 to vector<8x16xf32>
      %289 = arith.select %215, %287, %288 : vector<8x16xi1>, vector<8x16xf32>
      %290 = vector.shape_cast %289 : vector<8x16xf32> to vector<1x8x16xf32>
      %cst_95 = arith.constant dense<0.000000e+00> : vector<1xf32>
      %291 = vector.multi_reduction <add>, %290, %cst_95 [1, 2] : vector<1x8x16xf32> to vector<1xf32>
      %292 = vector.shape_cast %291 : vector<1xf32> to vector<1x1x1xf32>
      %293 = vector.extract %292[0, 0, 0] : f32 from vector<1x1x1xf32>
      %294 = vector.broadcast %293 : f32 to vector<1x1xf32>
      %cst_96 = arith.constant 4.000000e+00 : f32
      %295 = vector.broadcast %cst_96 : f32 to vector<1x1xf32>
      %296 = arith.mulf %294, %295 : vector<1x1xf32>
      %cst_97 = arith.constant 1.250000e-01 : f32
      %297 = vector.broadcast %cst_97 : f32 to vector<1x1xf32>
      %298 = arith.mulf %296, %297 : vector<1x1xf32>
      %cst_98 = arith.constant 3.000000e+00 : f32
      %299 = vector.broadcast %cst_98 : f32 to vector<1x1xf32>
      %300 = arith.divf %298, %299 : vector<1x1xf32>
      %cst_99 = arith.constant 5.000000e-01 : f32
      %301 = vector.broadcast %cst_99 : f32 to vector<1x1xf32>
      %302 = arith.mulf %246, %301 : vector<1x1xf32>
      %cst_100 = arith.constant 5.000000e-01 : f32
      %303 = vector.broadcast %cst_100 : f32 to vector<1x1xf32>
      %304 = arith.mulf %300, %303 : vector<1x1xf32>
      %305 = arith.addf %302, %304 : vector<1x1xf32>
      %306 = tpu.iota {dimensions = array<i32: 1>} : vector<1x128xi32>
      %cst_101 = arith.constant 0.000000e+00 : f32
      %307 = vector.broadcast %cst_101 : f32 to vector<1x128xf32>
      %c0_i32_102 = arith.constant 0 : i32
      %308 = vector.broadcast %c0_i32_102 : i32 to vector<1x128xi32>
      %309 = arith.cmpi eq, %306, %308 : vector<1x128xi32>
      %310 = vector.shape_cast %115 : vector<1x1xf32> to vector<1x1xf32>
      %311 = vector.broadcast %310 : vector<1x1xf32> to vector<1x128xf32>
      %312 = arith.select %309, %311, %307 : vector<1x128xi1>, vector<1x128xf32>
      %c1_i32 = arith.constant 1 : i32
      %313 = vector.broadcast %c1_i32 : i32 to vector<1x128xi32>
      %314 = arith.cmpi eq, %306, %313 : vector<1x128xi32>
      %315 = vector.shape_cast %210 : vector<1x1xf32> to vector<1x1xf32>
      %316 = vector.broadcast %315 : vector<1x1xf32> to vector<1x128xf32>
      %317 = arith.select %314, %316, %312 : vector<1x128xi1>, vector<1x128xf32>
      %c2_i32 = arith.constant 2 : i32
      %318 = vector.broadcast %c2_i32 : i32 to vector<1x128xi32>
      %319 = arith.cmpi eq, %306, %318 : vector<1x128xi32>
      %320 = vector.shape_cast %305 : vector<1x1xf32> to vector<1x1xf32>
      %321 = vector.broadcast %320 : vector<1x1xf32> to vector<1x128xf32>
      %322 = arith.select %319, %321, %317 : vector<1x128xi1>, vector<1x128xf32>
      %c0_103 = arith.constant 0 : index
      %c0_104 = arith.constant 0 : index
      %323 = vector.load %arg7[%c0_103, %c0_104] : memref<1x128xf32, #tpu.memory_space<vmem>>, vector<1x128xf32>
      tpu.vector_store %arg7[%c0_103, %c0_104], %322 {strides = array<i32>} : memref<1x128xf32, #tpu.memory_space<vmem>>, vector<1x128xf32>,
    } else {
    }
    return
  }
  func.func @transform_0(%arg0: i32) -> (i32, i32) {
    %c0_i32 = arith.constant 0 : i32
    %c0_i32_0 = arith.constant 0 : i32
    return %c0_i32, %arg0 : i32, i32
  }
  func.func @transform_1(%arg0: i32) -> (i32, i32) {
    %c0_i32 = arith.constant 0 : i32
    %c0_i32_0 = arith.constant 0 : i32
    return %arg0, %c0_i32 : i32, i32
  }
  func.func @transform_2(%arg0: i32) -> (i32, i32) {
    %c0_i32 = arith.constant 0 : i32
    %c0_i32_0 = arith.constant 0 : i32
    %c0_i32_1 = arith.constant 0 : i32
    return %c0_i32, %c0_i32_0 : i32, i32
  }
  func.func @transform_3(%arg0: i32) -> (i32, i32) {
    %c0_i32 = arith.constant 0 : i32
    %c0_i32_0 = arith.constant 0 : i32
    %c0_i32_1 = arith.constant 0 : i32
    return %c0_i32, %c0_i32_0 : i32, i32
  }
  func.func @transform_4(%arg0: i32) -> (i32, i32) {
    %c0_i32 = arith.constant 0 : i32
    %c0_i32_0 = arith.constant 0 : i32
    %c0_i32_1 = arith.constant 0 : i32
    return %c0_i32, %c0_i32_0 : i32, i32
  }
  func.func @transform_5(%arg0: i32) -> (i32, i32) {
    %c0_i32 = arith.constant 0 : i32
    %c0_i32_0 = arith.constant 0 : i32
    %c0_i32_1 = arith.constant 0 : i32
    return %c0_i32, %c0_i32_0 : i32, i32
  }
  func.func @transform_6(%arg0: i32) -> (i32, i32) {
    %c0_i32 = arith.constant 0 : i32
    %c0_i32_0 = arith.constant 0 : i32
    %c0_i32_1 = arith.constant 0 : i32
    return %c0_i32, %c0_i32_0 : i32, i32
  }
}

</mosaic_0001>

<bundles_post_ra>
// kernel: tpu_custom_call.1
= control target key start
LH: loop header
LB: loop body
LE: loop exit
PB: predicated region body
PF: predicated region fallthrough
CT: control target
= control target key end

     0   :  { %s1864_s0 = inlined_call_operand.vmem [shape: f32[8,1024], index: 0, kind: input, shape index: {}]   ;;  %s1865_s1 = inlined_call_operand.vmem [shape: bf16[1024,16], index: 1, kind: input, shape index: {}]   ;;  %s1866_s2 = inlined_call_operand.vmem [shape: f32[1,16], index: 2, kind: input, shape index: {}]   ;;  %s1867_s3 = inlined_call_operand.vmem [shape: f32[8,16], index: 3, kind: input, shape index: {}]   ;;  %s1868_s4 = inlined_call_operand.vmem [shape: f32[8,16], index: 4, kind: input, shape index: {}]   ;;  %s1869_s5 = inlined_call_operand.vmem [shape: s32[8,3], index: 5, kind: input, shape index: {}]   ;;  %s1870_s6 = inlined_call_operand.hbm [shape: f32[1,128], index: 6, kind: output, shape index: {}]  }
   0x1   :  { %v1268_v0 = vld [vmem:[%s1865_s1 + $0x38] sm:$0xff]  ;;  %v1267_v4 = vld [vmem:[%s1865_s1 + $0x30] sm:$0xff]  ;;  %v1266_v8 = vld [vmem:[%s1865_s1 + $0x28] sm:$0xff] }
   0x2   :  { %v1276_v1 = vld [vmem:[%s1865_s1 + $0x78] sm:$0xff]  ;;  %559 = vmatpush.bf16.msra.mxu0 %v1268_v0  ;;  %v1275_v5 = vld [vmem:[%s1865_s1 + $0x70] sm:$0xff]  ;;  %v1274_v9 = vld [vmem:[%s1865_s1 + $0x68] sm:$0xff] }
   0x3   :  { %v1284_v2 = vld [vmem:[%s1865_s1 + $0xb8] sm:$0xff]  ;;  %572 = vmatpush.bf16.msra.mxu1 %v1276_v1  ;;  %v1283_v6 = vld [vmem:[%s1865_s1 + $0xb0] sm:$0xff]  ;;  %v1282_v10 = vld [vmem:[%s1865_s1 + $0xa8] sm:$0xff] }
   0x4   :  { %v1292_v3 = vld [vmem:[%s1865_s1 + $0xf8] sm:$0xff]  ;;  %585 = vmatpush.bf16.msra.mxu2 %v1284_v2  ;;  %v1291_v7 = vld [vmem:[%s1865_s1 + $0xf0] sm:$0xff]  ;;  %v1290_v11 = vld [vmem:[%s1865_s1 + $0xe8] sm:$0xff] }
   0x5   :  { %598 = vmatpush.bf16.msra.mxu3 %v1292_v3  ;;  %v1265_v12 = vld [vmem:[%s1865_s1 + $0x20] sm:$0xff]  ;;  %v1264_v16 = vld [vmem:[%s1865_s1 + $0x18] sm:$0xff]  ;;  %v1263_v20 = vld [vmem:[%s1865_s1 + $0x10] sm:$0xff] }
   0x6   :  { %560 = vmatpush.bf16.msra.mxu0 %v1267_v4  ;;  %v1273_v13 = vld [vmem:[%s1865_s1 + $0x60] sm:$0xff]  ;;  %v1272_v17 = vld [vmem:[%s1865_s1 + $0x58] sm:$0xff]  ;;  %v1271_v21 = vld [vmem:[%s1865_s1 + $0x50] sm:$0xff] }
   0x7   :  { %573 = vmatpush.bf16.msra.mxu1 %v1275_v5  ;;  %v1281_v14 = vld [vmem:[%s1865_s1 + $0xa0] sm:$0xff]  ;;  %v1280_v18 = vld [vmem:[%s1865_s1 + $0x98] sm:$0xff]  ;;  %v1279_v22 = vld [vmem:[%s1865_s1 + $0x90] sm:$0xff] }
   0x8   :  { %586 = vmatpush.bf16.msra.mxu2 %v1283_v6  ;;  %v1289_v15 = vld [vmem:[%s1865_s1 + $0xe0] sm:$0xff]  ;;  %v1288_v19 = vld [vmem:[%s1865_s1 + $0xd8] sm:$0xff]  ;;  %v1287_v23 = vld [vmem:[%s1865_s1 + $0xd0] sm:$0xff] }
   0x9   :  { %599 = vmatpush.bf16.msra.mxu3 %v1291_v7 }
   0xa   :  { %561 = vmatpush.bf16.msra.mxu0 %v1266_v8 }
   0xb   :  { %574 = vmatpush.bf16.msra.mxu1 %v1274_v9 }
   0xc   :  { %587 = vmatpush.bf16.msra.mxu2 %v1282_v10 }
   0xd   :  { %600 = vmatpush.bf16.msra.mxu3 %v1290_v11 }
   0xe   :  { %562 = vmatpush.bf16.msra.mxu0 %v1265_v12 }
   0xf   :  { %575 = vmatpush.bf16.msra.mxu1 %v1273_v13 }
  0x10   :  { %588 = vmatpush.bf16.msra.mxu2 %v1281_v14 }
  0x11   :  { %601 = vmatpush.bf16.msra.mxu3 %v1289_v15 }
  0x12   :  { %563 = vmatpush.bf16.msra.mxu0 %v1264_v16 }
  0x13   :  { %576 = vmatpush.bf16.msra.mxu1 %v1272_v17 }
  0x14   :  { %589 = vmatpush.bf16.msra.mxu2 %v1280_v18 }
  0x15   :  { %602 = vmatpush.bf16.msra.mxu3 %v1288_v19 }
  0x16   :  { %11 = vsyncpa [#allocation4], 0  ;;  %564 = vmatpush.bf16.msra.mxu0 %v1263_v20  ;;  %v1262_v24 = vld [vmem:[%s1865_s1 + $0x8] sm:$0xff]  ;;  %v1261_v28 = vld [vmem:[%s1865_s1] sm:$0xff]  ;;  %vm28_vm0 = vcmask 130048   ;;  %v1424_v18 = vmov 0.0   ;;  %v678_v19 = vlaneseq }
  0x17   :  { %577 = vmatpush.bf16.msra.mxu1 %v1271_v21  ;;  %v1270_v25 = vld [vmem:[%s1865_s1 + $0x48] sm:$0xff]  ;;  %v1269_v29 = vld [vmem:[%s1865_s1 + $0x40] sm:$0xff]  ;;  %v1300_v32 = vld [vmem:[%s1865_s1 + $0x138] sm:$0xff]  ;;  %29 = vst.msk [vmem:[#allocation2] sm:$0xff] %vm28_vm0, %v1424_v18  ;;  %vm708_vm11 = vcmask 7168   ;;  %s1431_s29 = smov [#allocation3]  }
  0x18   :  { %590 = vmatpush.bf16.msra.mxu2 %v1279_v22  ;;  %v1278_v26 = vld [vmem:[%s1865_s1 + $0x88] sm:$0xff]  ;;  %v1277_v30 = vld [vmem:[%s1865_s1 + $0x80] sm:$0xff]  ;;  %v32_v33 = vld [vmem:[%s1864_s0 + $0x10] sm:$0xff]  ;;  %v1688_v21 = vand.u32 127, %v678_v19  ;;  %s991_s30 = sshll.u32 %s1431_s29, 4  ;;  %s993_s9 = sshll.u32 %s1870_s6, 4  ;;  %s992_s30 = int_to_ptr.vmem [resolvable:$true] %s991_s30  ;;  %s994_s9 = int_to_ptr.hbm [resolvable:$true] %s993_s9 }
  0x19   :  { %603 = vmatpush.bf16.msra.mxu3 %v1287_v23  ;;  %v1286_v27 = vld [vmem:[%s1865_s1 + $0xc8] sm:$0xff]  ;;  %v1285_v31 = vld [vmem:[%s1865_s1 + $0xc0] sm:$0xff]  ;;  %v1308_v35 = vld [vmem:[%s1865_s1 + $0x178] sm:$0xff]  ;;  %v40_v40 = vpack.c.bf16 %v32_v33, %v32_v33 }
  0x1a   :  { %565 = vmatpush.bf16.msra.mxu0 %v1262_v24  ;;  %v30_v34 = vld [vmem:[%s1864_s0] sm:$0xff]  ;;  %v33_v36 = vld [vmem:[%s1864_s0 + $0x18] sm:$0xff]  ;;  %v31_v37 = vld [vmem:[%s1864_s0 + $0x8] sm:$0xff]  ;;  %vm681_vm1 = vcmp.lt.s32.totalorder %v1688_v21, 6  ;;  %vm781_vm2 = vcmp.ge.s32.totalorder %v1688_v21, 6  ;;  %vm782_vm3 = vcmp.lt.s32.totalorder %v1688_v21, 11 }
  0x1b   :  { %578 = vmatpush.bf16.msra.mxu1 %v1270_v25  ;;  %v1316_v38 = vld [vmem:[%s1865_s1 + $0x1b8] sm:$0xff]  ;;  %v38_v41 = vpack.c.bf16 %v30_v34, %v30_v34  ;;  %v41_v42 = vpack.c.bf16 %v33_v36, %v33_v36  ;;  %v39_v43 = vpack.c.bf16 %v31_v37, %v31_v37  ;;  %v1299_v44 = vld [vmem:[%s1865_s1 + $0x130] sm:$0xff]  ;;  %v1298_v48 = vld [vmem:[%s1865_s1 + $0x128] sm:$0xff]  ;;  %vm880_vm4 = vcmp.ge.s32.totalorder %v1688_v21, 11 }
  0x1c   :  { %591 = vmatpush.bf16.msra.mxu2 %v1278_v26  ;;  %v1324_v39 = vld [vmem:[%s1865_s1 + $0x1f8] sm:$0xff]  ;;  %v1307_v45 = vld [vmem:[%s1865_s1 + $0x170] sm:$0xff]  ;;  %v1306_v49 = vld [vmem:[%s1865_s1 + $0x168] sm:$0xff]  ;;  %vm881_vm5 = vcmp.lt.s32.totalorder %v1688_v21, 14  ;;  %vm979_vm15 = vcmp.eq.s32.totalorder %v1688_v21, 0 }
  0x1d   :  { %604 = vmatpush.bf16.msra.mxu3 %v1286_v27  ;;  %v1315_v46 = vld [vmem:[%s1865_s1 + $0x1b0] sm:$0xff]  ;;  %v1314_v50 = vld [vmem:[%s1865_s1 + $0x1a8] sm:$0xff]  ;;  %v1297_v52 = vld [vmem:[%s1865_s1 + $0x120] sm:$0xff] }
  0x1e   :  { %566 = vmatpush.bf16.msra.mxu0 %v1261_v28  ;;  %v1323_v47 = vld [vmem:[%s1865_s1 + $0x1f0] sm:$0xff]  ;;  %v1322_v51 = vld [vmem:[%s1865_s1 + $0x1e8] sm:$0xff]  ;;  %v1305_v53 = vld [vmem:[%s1865_s1 + $0x160] sm:$0xff] }
  0x1f   :  { %579 = vmatpush.bf16.msra.mxu1 %v1269_v29  ;;  %v1313_v54 = vld [vmem:[%s1865_s1 + $0x1a0] sm:$0xff]  ;;  %v1296_v56 = vld [vmem:[%s1865_s1 + $0x118] sm:$0xff]  ;;  %v1295_v60 = vld [vmem:[%s1865_s1 + $0x110] sm:$0xff] }
  0x20   :  { %592 = vmatpush.bf16.msra.mxu2 %v1277_v30  ;;  %v1321_v55 = vld [vmem:[%s1865_s1 + $0x1e0] sm:$0xff]  ;;  %v1304_v57 = vld [vmem:[%s1865_s1 + $0x158] sm:$0xff]  ;;  %v1303_v61 = vld [vmem:[%s1865_s1 + $0x150] sm:$0xff] }
  0x21   :  { %605 = vmatpush.bf16.msra.mxu3 %v1285_v31  ;;  %567 = vmatmul.bf16.vlgmr.msra.gmra.mxu0 %v38_v41  ;;  %v1312_v58 = vld [vmem:[%s1865_s1 + $0x198] sm:$0xff]  ;;  %v1311_v62 = vld [vmem:[%s1865_s1 + $0x190] sm:$0xff]  ;;  %v1294_v0 = vld [vmem:[%s1865_s1 + $0x108] sm:$0xff] }
  0x22   :  { %611 = vmatpush.bf16.msrb.mxu0 %v1300_v32  ;;  %580 = vmatmul.bf16.vlgmr.msra.gmra.mxu1 %v39_v43  ;;  %v1320_v59 = vld [vmem:[%s1865_s1 + $0x1d8] sm:$0xff]  ;;  %v1319_v63 = vld [vmem:[%s1865_s1 + $0x1d0] sm:$0xff]  ;;  %v1302_v1 = vld [vmem:[%s1865_s1 + $0x148] sm:$0xff] }
  0x23   :  { %624 = vmatpush.bf16.msrb.mxu1 %v1308_v35  ;;  %593 = vmatmul.bf16.vlgmr.msra.gmra.mxu2 %v40_v40  ;;  %v1310_v2 = vld [vmem:[%s1865_s1 + $0x188] sm:$0xff]  ;;  %v1293_v4 = vld [vmem:[%s1865_s1 + $0x100] sm:$0xff]  ;;  %v36_v10 = vld [vmem:[%s1864_s0 + $0x30] sm:$0xff] }
  0x24   :  { %637 = vmatpush.bf16.msrb.mxu2 %v1316_v38  ;;  %606 = vmatmul.bf16.vlgmr.msra.gmra.mxu3 %v41_v42  ;;  %v1318_v3 = vld [vmem:[%s1865_s1 + $0x1c8] sm:$0xff]  ;;  %v1301_v5 = vld [vmem:[%s1865_s1 + $0x140] sm:$0xff]  ;;  %v37_v11 = vld [vmem:[%s1864_s0 + $0x38] sm:$0xff]  ;;  %v44_v14 = vpack.c.bf16 %v36_v10, %v36_v10 }
  0x25   :  { %650 = vmatpush.bf16.msrb.mxu3 %v1324_v39  ;;  %v1309_v6 = vld [vmem:[%s1865_s1 + $0x180] sm:$0xff]  ;;  %v35_v8 = vld [vmem:[%s1864_s0 + $0x28] sm:$0xff]  ;;  %v45_v15 = vpack.c.bf16 %v37_v11, %v37_v11  ;;  %vm1706_vm6 = vmand %vm781_vm2, %vm782_vm3 }
  0x26   :  { %612 = vmatpush.bf16.msrb.mxu0 %v1299_v44  ;;  %v34_v7 = vld [vmem:[%s1864_s0 + $0x20] sm:$0xff]  ;;  %v43_v13 = vpack.c.bf16 %v35_v8, %v35_v8  ;;  %vm1730_vm7 = vmand %vm880_vm4, %vm881_vm5 }
  0x27   :  { %625 = vmatpush.bf16.msrb.mxu1 %v1307_v45  ;;  %v1317_v9 = vld [vmem:[%s1865_s1 + $0x1c0] sm:$0xff]  ;;  %v42_v12 = vpack.c.bf16 %v34_v7, %v34_v7 }
  0x28   :  { %638 = vmatpush.bf16.msrb.mxu2 %v1315_v46  ;;  %v676_v20 = vld [vmem:[%s1868_s4] sm:$0xff] }
  0x29   :  { %651 = vmatpush.bf16.msrb.mxu3 %v1323_v47  ;;  %v721_v22 = vmul.f32 0.5, %v676_v20  ;;  %v1702_v29 = vld [vmem:[%s1867_s3] sm:$0xff] }
  0x2a   :  { %613 = vmatpush.bf16.msrb.mxu0 %v1298_v48  ;;  %v1713_v31 = vsel %vm681_vm1, %v1702_v29, -1e+30  ;;  %v1722_v34 = vsel %vm1706_vm6, %v1702_v29, -1e+30  ;;  %v884_v44 = vsel %vm1730_vm7, %v1702_v29, -1e+30 }
  0x2b   :  { %626 = vmatpush.bf16.msrb.mxu1 %v1306_v49  ;;  %v1693_v25 = vsel %vm681_vm1, %v721_v22, -1e+30  ;;  %v1717_v33 = vsel %vm1706_vm6, %v721_v22, -1e+30  ;;  %v684_v35 = vsel %vm28_vm0, %v1713_v31, -inf  ;;  %v786_v38 = vsel %vm28_vm0, %v1722_v34, -inf }
  0x2c   :  { %639 = vmatpush.bf16.msrb.mxu2 %v1314_v50  ;;  %v723_v27 = vsel %vm28_vm0, %v1693_v25, -inf  ;;  %v823_v37 = vsel %vm28_vm0, %v1717_v33, -inf  ;;  %685 = vmax.xlane.f32.xlu0 %v684_v35  ;;  %v1736_v40 = vsel %vm1730_vm7, %v721_v22, -1e+30  ;;  %v885_v48 = vsel %vm28_vm0, %v884_v44, -inf }
  0x2d   :  { %652 = vmatpush.bf16.msrb.mxu3 %v1322_v51  ;;  %724 = vmax.xlane.f32.xlu1 %v723_v27  ;;  %v922_v42 = vsel %vm28_vm0, %v1736_v40, -inf  ;;  %v1425_v50 = vmov 1   ;;  %v1426_v51 = vmov 0  }
  0x2e   :  { %614 = vmatpush.bf16.msrb.mxu0 %v1297_v52  ;;  %824 = vmax.xlane.f32.xlu2 %v823_v37 }
  0x2f   :  { %627 = vmatpush.bf16.msrb.mxu1 %v1305_v53  ;;  %1346 = vset.pattern.permute.xlu1 %v1425_v50 }
  0x30   :  { %640 = vmatpush.bf16.msrb.mxu2 %v1313_v54  ;;  %1345 = vset.pattern.permute.xlu0 %v1426_v51 }
  0x31   :  { %653 = vmatpush.bf16.msrb.mxu3 %v1321_v55 }
  0x32   :  { %615 = vmatpush.bf16.msrb.mxu0 %v1296_v56 }
  0x33   :  { %628 = vmatpush.bf16.msrb.mxu1 %v1304_v57 }
  0x34   :  { %641 = vmatpush.bf16.msrb.mxu2 %v1312_v58  ;;  %v46_v58 = vld [vmem:[#allocation2] sm:$0xff] }
  0x35   :  { %654 = vmatpush.bf16.msrb.mxu3 %v1320_v59  ;;  %787 = vmax.xlane.f32.xlu1 %v786_v38 }
  0x36   :  { %616 = vmatpush.bf16.msrb.mxu0 %v1295_v60  ;;  %923 = vmax.xlane.f32.xlu2 %v922_v42 }
  0x37   :  { %629 = vmatpush.bf16.msrb.mxu1 %v1303_v61 }
  0x38   :  { %642 = vmatpush.bf16.msrb.mxu2 %v1311_v62 }
  0x39   :  { %655 = vmatpush.bf16.msrb.mxu3 %v1319_v63  ;;  %v1349_v63 = vld [vmem:[%s1866_s2] ss:$0 sm:$0xff] }
  0x3a   :  { %617 = vmatpush.bf16.msrb.mxu0 %v1294_v0 }
  0x3b   :  { %630 = vmatpush.bf16.msrb.mxu1 %v1302_v1 }
  0x3c   :  { %643 = vmatpush.bf16.msrb.mxu2 %v1310_v2  ;;  %v677_v2 = vld [vmem:[%s1869_s5] sm:$0xff] }
  0x3d   :  { %656 = vmatpush.bf16.msrb.mxu3 %v1318_v3 }
  0x3e   :  { %618 = vmatpush.bf16.msrb.mxu0 %v1293_v4  ;;  %886 = vmax.xlane.f32.xlu2 %v885_v48  ;;  %v883_v4 = vadd.s32 11, %v677_v2 }
  0x3f   :  { %631 = vmatpush.bf16.msrb.mxu1 %v1301_v5  ;;  %v1427_v5 = vmov 2  }
  0x40   :  { %644 = vmatpush.bf16.msrb.mxu2 %v1309_v6  ;;  %1347 = vset.pattern.permute.xlu2 %v1427_v5 }
  0x41   :  { %657 = vmatpush.bf16.msrb.mxu3 %v1317_v9  ;;  %619 = vmatmul.bf16.vlgmr.msrb.gmra.mxu0 %v42_v12  ;;  %v784_v12 = vadd.s32 6, %v677_v2 }
  0x42   :  { %632 = vmatmul.bf16.vlgmr.msrb.gmra.mxu1 %v43_v13 }
  0x43   :  { %645 = vmatmul.bf16.vlgmr.msrb.gmra.mxu2 %v44_v14 }
  0x44   :  { %658 = vmatmul.bf16.vlgmr.msrb.gmra.mxu3 %v45_v15 }
  0x56   :  { %899 = vperm.xlu2 %1347, %v883_v4  }
  0x9e   :  { %v568_v16 = vpop.f32.mrf.mxu0 }
  0x9f   :  { %v581_v17 = vpop.f32.mrf.mxu1 }
  0xa0   :  { %v582_v41 = vadd.f32 %v581_v17, %v568_v16  ;;  %v725_v14 = vpop.xlane.xlu1 %724  ;;  %v1762_v17 = vpop.xlane.xlu0 %685 }
  0xa1   :  { %v825_v13 = vpop.xlane.xlu2 %824  ;;  %v1772_v27 = vsub.f32 %v1693_v25, %v725_v14 }
  0xa6   :  { %v594_v23 = vpop.f32.mrf.mxu2  ;;  %v570_v26 = vpop.f32.mrf.mxu0 }
  0xa7   :  { %v607_v24 = vpop.f32.mrf.mxu3  ;;  %v583_v28 = vpop.f32.mrf.mxu1  ;;  %v595_v43 = vadd.f32 %v594_v23, %v582_v41  ;;  %v1781_v41 = vsub.f32 %v1717_v33, %v825_v13 }
  0xa8   :  { %v1760_v16 = vpop.xlane.xlu1 %787 }
  0xa9   :  { %v608_v45 = vadd.f32 %v607_v24, %v595_v43  ;;  %v924_v15 = vpop.xlane.xlu2 %923 }
  0xaa   :  { %v1778_v37 = vsub.f32 %v1736_v40, %v924_v15  ;;  %v827_v40 = vmul.f32 1.442695, %v1781_v41 }
  0xae   :  { %v596_v32 = vpop.f32.mrf.mxu2 }
  0xaf   :  { %v609_v36 = vpop.f32.mrf.mxu3 }
  0xb0   :  { %v727_v36 = vmul.f32 1.442695, %v1772_v27 }
  0xb1   :  { %v1764_v19 = vpop.xlane.xlu2 %886 }
  0xb2   :  { %v888_v20 = vsub.f32 %v884_v44, %v1764_v19 }
  0xb4   :  { %v889_v35 = vmul.f32 1.442695, %v888_v20 }
  0xb9   :  { %v900_v50 = vpop.permute.xlu2 %899 }
  0xba   :  { %vm901_vm8 = vcmp.eq.s32.totalorder %v1688_v21, %v900_v50 }
  0xbe   :  { %v620_v46 = vpop.f32.mrf.mxu0 }
  0xbf   :  { %v633_v47 = vpop.f32.mrf.mxu1  ;;  %v621_v49 = vadd.f32 %v620_v46, %v608_v45  ;;  %v926_v45 = vmul.f32 1.442695, %v1778_v37 }
  0xc1   :  { %v634_v52 = vadd.f32 %v633_v47, %v621_v49 }
  0xc6   :  { %v646_v53 = vpop.f32.mrf.mxu2  ;;  %v622_v56 = vpop.f32.mrf.mxu0 }
  0xc7   :  { %v659_v54 = vpop.f32.mrf.mxu3  ;;  %v647_v55 = vadd.f32 %v646_v53, %v634_v52  ;;  %v635_v57 = vpop.f32.mrf.mxu1  ;;  %v687_v53 = vsub.f32 %v1713_v31, %v1762_v17 }
  0xc9   :  { %v660_v59 = vadd.f32 %v659_v54, %v647_v55  ;;  %v789_v54 = vsub.f32 %v1722_v34, %v1760_v16 }
  0xcb   :  { %v663_v60 = vadd.f32 %v660_v59, %v46_v58  ;;  %v1260_v59 = vsel %vm901_vm8, 1.0, %v1424_v18 }
  0xcd   :  { %665 = vst.msk [vmem:[#allocation2] sm:$0xff] %vm28_vm0, %v663_v60  ;;  %v688_v60 = vmul.f32 1.442695, %v687_v53 }
  0xce   :  { %v648_v61 = vpop.f32.mrf.mxu2 }
  0xcf   :  { %v661_v62 = vpop.f32.mrf.mxu3 }
  0xd0   :  { %v790_v62 = vmul.f32 1.442695, %v789_v54 }
  0xd4   :  { %v669_v0 = vld [vmem:[#allocation2] sm:$0xff] }
  0xd5   :  { %v674_v1 = vadd.f32 %v1349_v63, %v669_v0  ;;  %v904_v0 = vmul.f32 %v1260_v59, %v1702_v29 }
  0xd7   :  { %v736_v3 = vmul.f32 0.5, %v674_v1 }
  0xd9   :  { %v935_v6 = vsel %vm1730_vm7, %v736_v3, -1e+30  ;;  %v737_v7 = vsel %vm681_vm1, %v736_v3, -1e+30  ;;  %v836_v10 = vsel %vm1706_vm6, %v736_v3, -1e+30 }
  0xda   :  { %v936_v8 = vsel %vm28_vm0, %v935_v6, -inf  ;;  %v738_v9 = vsel %vm28_vm0, %v737_v7, -inf  ;;  %v837_v11 = vsel %vm28_vm0, %v836_v10, -inf  ;;  %v905_v3 = vsel %vm28_vm0, %v904_v0, 0.0 }
  0xdb   :  { %937 = vmax.xlane.f32.xlu1 %v936_v8  ;;  %739 = vmax.xlane.f32.xlu0 %v738_v9 }
  0xe3   :  { %838 = vmax.xlane.f32.xlu0 %v837_v11 }
  0xf4   :  { %800 = vperm.xlu1 %1346, %v784_v12  }
  0xf7   :  { %698 = vperm.xlu0 %1345, %v677_v2  }
  0xff   :  { %1348 = vset.pattern.permute.xlu0 %v1427_v5 }
 0x14e   :  { %v938_v22 = vpop.xlane.xlu1 %937  ;;  %v740_v23 = vpop.xlane.xlu0 %739 }
 0x14f   :  { %v1767_v24 = vsub.f32 %v935_v6, %v938_v22  ;;  %v1769_v26 = vsub.f32 %v737_v7, %v740_v23 }
 0x151   :  { %v940_v28 = vmul.f32 1.442695, %v1767_v24  ;;  %v742_v32 = vmul.f32 1.442695, %v1769_v26 }
 0x153   :  { %1350 = vpow2.f32 %v940_v28 }
 0x154   :  { %1352 = vpow2.f32 %v742_v32 }
 0x155   :  { %1354 = vpow2.f32 %v889_v35 }
 0x156   :  { %v839_v38 = vpop.xlane.xlu0 %838  ;;  %1356 = vpow2.f32 %v727_v36 }
 0x157   :  { %v1783_v42 = vsub.f32 %v836_v10, %v839_v38 }
 0x159   :  { %v1351_v25 = vpop.eup %1350  ;;  %v841_v43 = vmul.f32 1.442695, %v1783_v42 }
 0x15a   :  { %v1353_v44 = vpop.eup %1352  ;;  %v942_v46 = vsel %vm1730_vm7, %v1351_v25, 0.0 }
 0x15b   :  { %v1355_v47 = vpop.eup %1354  ;;  %1358 = vpow2.f32 %v841_v43  ;;  %v943_v48 = vsel %vm28_vm0, %v942_v46, 0.0  ;;  %v744_v33 = vsel %vm681_vm1, %v1353_v44, 0.0 }
 0x15c   :  { %944 = vadd.xlane.f32.xlu0 %v943_v48  ;;  %v745_v49 = vsel %vm28_vm0, %v744_v33, 0.0  ;;  %v1357_v51 = vpop.eup %1356  ;;  %1360 = vpow2.f32 %v926_v45  ;;  %v891_v52 = vsel %vm1730_vm7, %v1355_v47, 0.0 }
 0x15d   :  { %746 = vadd.xlane.f32.xlu2 %v745_v49  ;;  %1362 = vpow2.f32 %v827_v40  ;;  %v892_v56 = vsel %vm28_vm0, %v891_v52, 0.0  ;;  %v729_v57 = vsel %vm681_vm1, %v1357_v51, 0.0 }
 0x15e   :  { %v730_v63 = vsel %vm28_vm0, %v729_v57, 0.0  ;;  %1364 = vpow2.f32 %v688_v60 }
 0x15f   :  { %1366 = vpow2.f32 %v790_v62 }
 0x161   :  { %v1359_v55 = vpop.eup %1358 }
 0x162   :  { %v843_v58 = vsel %vm1706_vm6, %v1359_v55, 0.0  ;;  %v1361_v31 = vpop.eup %1360 }
 0x163   :  { %v844_v61 = vsel %vm28_vm0, %v843_v58, 0.0  ;;  %v1363_v34 = vpop.eup %1362  ;;  %v928_v1 = vsel %vm1730_vm7, %v1361_v31, 0.0 }
 0x164   :  { %893 = vadd.xlane.f32.xlu0 %v892_v56  ;;  %845 = vadd.xlane.f32.xlu1 %v844_v61  ;;  %v829_v2 = vsel %vm1706_vm6, %v1363_v34, 0.0  ;;  %v929_v4 = vsel %vm28_vm0, %v928_v1, 0.0  ;;  %v1365_v7 = vpop.eup %1364 }
 0x165   :  { %731 = vadd.xlane.f32.xlu2 %v730_v63  ;;  %v830_v5 = vsel %vm28_vm0, %v829_v2, 0.0  ;;  %v1367_v9 = vpop.eup %1366  ;;  %v690_v10 = vsel %vm681_vm1, %v1365_v7, 0.0 }
 0x166   :  { %v801_v8 = vpop.permute.xlu1 %800  ;;  %v792_v11 = vsel %vm1706_vm6, %v1367_v9, 0.0  ;;  %v691_v13 = vsel %vm28_vm0, %v690_v10, 0.0 }
 0x167   :  { %vm802_vm10 = vcmp.eq.s32.totalorder %v1688_v21, %v801_v8  ;;  %v793_v15 = vsel %vm28_vm0, %v792_v11, 0.0 }
 0x168   :  { %v1259_v14 = vsel %vm802_vm10, 1.0, %v1424_v18 }
 0x169   :  { %v699_v6 = vpop.permute.xlu0 %698  ;;  %v805_v22 = vmul.f32 %v1259_v14, %v1702_v29 }
 0x16a   :  { %vm700_vm9 = vcmp.eq.s32.totalorder %v1688_v21, %v699_v6 }
 0x16b   :  { %v1258_v12 = vsel %vm700_vm9, 1.0, %v1424_v18  ;;  %v806_v28 = vsel %vm28_vm0, %v805_v22, 0.0 }
 0x16c   :  { %831 = vadd.xlane.f32.xlu1 %v830_v5  ;;  %906 = vadd.xlane.f32.xlu0 %v905_v3  ;;  %v703_v20 = vmul.f32 %v1258_v12, %v1702_v29 }
 0x16d   :  { %930 = vadd.xlane.f32.xlu2 %v929_v4 }
 0x16e   :  { %v704_v23 = vsel %vm28_vm0, %v703_v20, 0.0 }
 0x174   :  { %692 = vadd.xlane.f32.xlu1 %v691_v13 }
 0x175   :  { %794 = vadd.xlane.f32.xlu2 %v793_v15 }
 0x17c   :  { %705 = vadd.xlane.f32.xlu1 %v704_v23 }
 0x17d   :  { %807 = vadd.xlane.f32.xlu2 %v806_v28 }
 0x1cf   :  { %v945_v32 = vpop.xlane.xlu0 %944 }
 0x1d0   :  { %v747_v35 = vpop.xlane.xlu2 %746 }
 0x1d1   :  { %1368 = vlog2.f32 %v747_v35 }
 0x1d2   :  { %1370 = vlog2.f32 %v945_v32 }
 0x1d7   :  { %v1369_v36 = vpop.eup %1368  ;;  %v846_v18 = vpop.xlane.xlu1 %845 }
 0x1d8   :  { %v749_v38 = vmul.f32 0.6931472, %v1369_v36  ;;  %v732_v25 = vpop.xlane.xlu2 %731  ;;  %1372 = vlog2.f32 %v846_v18  ;;  %v894_v43 = vpop.xlane.xlu0 %893 }
 0x1d9   :  { %1374 = vlog2.f32 %v732_v25  ;;  %v1371_v45 = vpop.eup %1370 }
 0x1da   :  { %v750_v44 = vsub.f32 %v1769_v26, %v749_v38  ;;  %1376 = vlog2.f32 %v894_v43  ;;  %v947_v50 = vmul.f32 0.6931472, %v1371_v45 }
 0x1dc   :  { %v751_v29 = vmul.f32 1.442695, %v750_v44  ;;  %v948_v55 = vsub.f32 %v1767_v24, %v947_v50 }
 0x1de   :  { %v1373_v46 = vpop.eup %1372  ;;  %1378 = vpow2.f32 %v751_v29 }
 0x1df   :  { %v1375_v47 = vpop.eup %1374  ;;  %v848_v40 = vmul.f32 0.6931472, %v1373_v46  ;;  %v832_v48 = vpop.xlane.xlu1 %831 }
 0x1e0   :  { %v734_v33 = vmul.f32 0.6931472, %v1375_v47  ;;  %v931_v49 = vpop.xlane.xlu2 %930  ;;  %1380 = vlog2.f32 %v832_v48  ;;  %v1377_v51 = vpop.eup %1376 }
 0x1e1   :  { %v849_v53 = vsub.f32 %v1783_v42, %v848_v40  ;;  %1382 = vlog2.f32 %v931_v49  ;;  %v896_v56 = vmul.f32 0.6931472, %v1377_v51  ;;  %v949_v42 = vmul.f32 1.442695, %v948_v55  ;;  %v907_v0 = vpop.xlane.xlu0 %906 }
 0x1e2   :  { %v735_v52 = vsub.f32 %v1772_v27, %v734_v33 }
 0x1e3   :  { %v850_v58 = vmul.f32 1.442695, %v849_v53  ;;  %v897_v63 = vadd.f32 %v896_v56, %v1764_v19 }
 0x1e4   :  { %v1379_v54 = vpop.eup %1378  ;;  %v754_v26 = vsub.f32 %v750_v44, %v735_v52 }
 0x1e5   :  { %v753_v57 = vsel %vm681_vm1, %v1379_v54, 0.0  ;;  %v908_v2 = vsub.f32 %v897_v63, %v907_v0 }
 0x1e6   :  { %v755_v59 = vmul.f32 %v754_v26, %v753_v57  ;;  %v1381_v60 = vpop.eup %1380 }
 0x1e7   :  { %v693_v61 = vpop.xlane.xlu1 %692  ;;  %v1383_v31 = vpop.eup %1382  ;;  %v834_v34 = vmul.f32 0.6931472, %v1381_v60  ;;  %v909_v10 = vsel %vm708_vm11, %v908_v2, 0.0 }
 0x1e8   :  { %v795_v62 = vpop.xlane.xlu2 %794  ;;  %1384 = vlog2.f32 %v693_v61  ;;  %v756_v27 = vsel %vm681_vm1, %v755_v59, 0.0  ;;  %v933_v1 = vmul.f32 0.6931472, %v1383_v31  ;;  %vm983_vm1 = vcmp.eq.s32.totalorder %v1688_v21, 2 }
 0x1e9   :  { %1386 = vlog2.f32 %v795_v62  ;;  %v757_v24 = vsel %vm28_vm0, %v756_v27, 0.0  ;;  %v835_v4 = vsub.f32 %v1781_v41, %v834_v34 }
 0x1ea   :  { %1388 = vpow2.f32 %v850_v58  ;;  %758 = vadd.xlane.f32.xlu2 %v757_v24  ;;  %v934_v6 = vsub.f32 %v1778_v37, %v933_v1 }
 0x1eb   :  { %1390 = vpow2.f32 %v949_v42  ;;  %v853_v14 = vsub.f32 %v849_v53, %v835_v4 }
 0x1ec   :  { %v952_v22 = vsub.f32 %v948_v55, %v934_v6 }
 0x1ee   :  { %v1385_v3 = vpop.eup %1384 }
 0x1ef   :  { %v1387_v5 = vpop.eup %1386  ;;  %v695_v7 = vmul.f32 0.6931472, %v1385_v3  ;;  %v706_v9 = vpop.xlane.xlu1 %705 }
 0x1f0   :  { %v1389_v8 = vpop.eup %1388  ;;  %v797_v19 = vmul.f32 0.6931472, %v1387_v5  ;;  %v808_v11 = vpop.xlane.xlu2 %807 }
 0x1f1   :  { %v696_v12 = vadd.f32 %v695_v7, %v1762_v17  ;;  %v1391_v15 = vpop.eup %1390  ;;  %v852_v41 = vsel %vm1706_vm6, %v1389_v8, 0.0 }
 0x1f2   :  { %910 = vadd.xlane.f32.xlu2 %v909_v10  ;;  %v798_v13 = vadd.f32 %v797_v19, %v1760_v16  ;;  %v854_v32 = vmul.f32 %v853_v14, %v852_v41  ;;  %v951_v17 = vsel %vm1730_vm7, %v1391_v15, 0.0  ;;  %v1428_v19 = vmov 6.0  }
 0x1f3   :  { %v707_v20 = vsub.f32 %v696_v12, %v706_v9  ;;  %v953_v35 = vmul.f32 %v952_v22, %v951_v17  ;;  %1392 = vrcp.f32 %v1428_v19  ;;  %v1429_v10 = vmov 5.0  }
 0x1f4   :  { %v809_v37 = vsub.f32 %v798_v13, %v808_v11  ;;  %v855_v16 = vsel %vm1706_vm6, %v854_v32, 0.0  ;;  %1394 = vrcp.f32 %v1429_v10  ;;  %v1430_v12 = vmov 3.0  }
 0x1f5   :  { %v709_v23 = vsel %vm708_vm11, %v707_v20, 0.0  ;;  %v954_v36 = vsel %vm1730_vm7, %v953_v35, 0.0  ;;  %v856_v18 = vsel %vm28_vm0, %v855_v16, 0.0  ;;  %1396 = vrcp.f32 %v1430_v12 }
 0x1f6   :  { %v810_v28 = vsel %vm708_vm11, %v809_v37, 0.0  ;;  %710 = vadd.xlane.f32.xlu1 %v709_v23  ;;  %v955_v38 = vsel %vm28_vm0, %v954_v36, 0.0  ;;  %vm981_vm0 = vcmp.eq.s32.totalorder %v1688_v21, 1 }
 0x1f7   :  { %811 = vadd.xlane.f32.xlu0 %v810_v28 }
 0x1f9   :  { %v1393_v9 = vpop.eup %1392 }
 0x1fa   :  { %v771_v11 = vmul.f32 6.0, %v1393_v9  ;;  %v1395_v13 = vpop.eup %1394  ;;  %vm775_vm12 = vweird.f32 %v1393_v9 }
 0x1fb   :  { %v1397_v15 = vpop.eup %1396  ;;  %v870_v20 = vmul.f32 5.0, %v1395_v13  ;;  %vm874_vm13 = vweird.f32 %v1395_v13 }
 0x1fc   :  { %v772_v14 = vsub.f32 1.0, %v771_v11  ;;  %v969_v22 = vmul.f32 3.0, %v1397_v15  ;;  %vm973_vm14 = vweird.f32 %v1397_v15 }
 0x1fd   :  { %v871_v37 = vsub.f32 1.0, %v870_v20 }
 0x1fe   :  { %857 = vadd.xlane.f32.xlu1 %v856_v18  ;;  %v773_v41 = vmul.f32 %v1393_v9, %v772_v14  ;;  %v970_v28 = vsub.f32 1.0, %v969_v22 }
 0x1ff   :  { %956 = vadd.xlane.f32.xlu0 %v955_v38  ;;  %v872_v35 = vmul.f32 %v1395_v13, %v871_v37 }
 0x200   :  { %v774_v23 = vadd.f32 %v1393_v9, %v773_v41  ;;  %v971_v18 = vmul.f32 %v1397_v15, %v970_v28 }
 0x202   :  { %v776_v16 = vsel %vm775_vm12, %v1393_v9, %v774_v23 }
 0x25d   :  { %v759_v25 = vpop.xlane.xlu2 %758 }
 0x25e   :  { %v760_v43 = vrot.slane %v759_v25, 4 }
 0x260   :  { %v761_v44 = vadd.f32 %v760_v43, %v759_v25  ;;  %v873_v43 = vadd.f32 %v1395_v13, %v872_v35 }
 0x262   :  { %v762_v45 = vrot.slane %v761_v44, 2 }
 0x264   :  { %v763_v50 = vadd.f32 %v762_v45, %v761_v44 }
 0x265   :  { %v911_v29 = vpop.xlane.xlu2 %910 }
 0x266   :  { %v912_v46 = vrot.slane %v911_v29, 4  ;;  %v764_v55 = vrot.slane %v763_v50, 1 }
 0x268   :  { %v913_v49 = vadd.f32 %v912_v46, %v911_v29  ;;  %v765_v63 = vadd.f32 %v764_v55, %v763_v50  ;;  %v972_v46 = vadd.f32 %v1397_v15, %v971_v18 }
 0x269   :  { %v711_v47 = vpop.xlane.xlu1 %710 }
 0x26a   :  { %v712_v40 = vrot.slane %v711_v47, 4  ;;  %v812_v48 = vpop.xlane.xlu0 %811  ;;  %v914_v54 = vrot.slane %v913_v49, 2 }
 0x26b   :  { %v813_v30 = vrot.slane %v812_v48, 4 }
 0x26c   :  { %v713_v33 = vadd.f32 %v712_v40, %v711_v47  ;;  %v915_v27 = vadd.f32 %v914_v54, %v913_v49 }
 0x26d   :  { %v814_v39 = vadd.f32 %v813_v30, %v812_v48  ;;  %v875_v48 = vsel %vm874_vm13, %v1395_v13, %v873_v43 }
 0x26e   :  { %v714_v51 = vrot.slane %v713_v33, 2  ;;  %v916_v3 = vrot.slane %v915_v27, 1 }
 0x26f   :  { %v815_v52 = vrot.slane %v814_v39, 2 }
 0x270   :  { %v715_v53 = vadd.f32 %v714_v51, %v713_v33  ;;  %v917_v7 = vadd.f32 %v916_v3, %v915_v27 }
 0x271   :  { %v858_v26 = vpop.xlane.xlu1 %857  ;;  %v816_v56 = vadd.f32 %v815_v52, %v814_v39  ;;  %v974_v52 = vsel %vm973_vm14, %v1397_v15, %v972_v46 }
 0x272   :  { %v859_v57 = vrot.slane %v858_v26, 4  ;;  %v957_v58 = vpop.xlane.xlu0 %956  ;;  %v716_v59 = vrot.slane %v715_v53, 1 }
 0x273   :  { %v958_v60 = vrot.slane %v957_v58, 4  ;;  %v817_v61 = vrot.slane %v816_v56, 1 }
 0x274   :  { %v860_v31 = vadd.f32 %v859_v57, %v858_v26  ;;  %v717_v62 = vadd.f32 %v716_v59, %v715_v53 }
 0x275   :  { %v959_v42 = vadd.f32 %v958_v60, %v957_v58  ;;  %v818_v24 = vadd.f32 %v817_v61, %v816_v56 }
 0x276   :  { %v861_v34 = vrot.slane %v860_v31, 2  ;;  %1325 = vpush %v717_v62 }
 0x277   :  { %v960_v0 = vrot.slane %v959_v42, 2  ;;  %1327 = vpush %v765_v63 }
 0x278   :  { %v862_v1 = vadd.f32 %v861_v34, %v860_v31  ;;  %1329 = vpush %v818_v24 }
 0x279   :  { %v961_v2 = vadd.f32 %v960_v0, %v959_v42 }
 0x27a   :  { %v863_v4 = vrot.slane %v862_v1, 1 }
 0x27b   :  { %v962_v5 = vrot.slane %v961_v2, 1 }
 0x27c   :  { %v864_v6 = vadd.f32 %v863_v4, %v862_v1 }
 0x27d   :  { %v963_v8 = vadd.f32 %v962_v5, %v961_v2 }
 0x27e   :  { %1331 = vpush %v864_v6 }
 0x27f   :  { %1333 = vpush %v917_v7 }
 0x280   :  { %1335 = vpush %v963_v8 }
 0x2a7   :  { %s1326_s2 = spop %1325 }
 0x2a8   :  { %s1328_s5 = spop %1327  ;;  %v719_v38 = vstv %s1326_s2 }
 0x2a9   :  { %v767_v32 = vstv %s1328_s5  ;;  %s1330_s25 = spop %1329  ;;  %v720_v44 = vmul.f32 0.125, %v719_v38 }
 0x2aa   :  { %v768_v17 = vmul.f32 4.0, %v767_v32  ;;  %v820_v29 = vstv %s1330_s25 }
 0x2ab   :  { %v821_v49 = vmul.f32 0.125, %v820_v29  ;;  %v778_v51 = vmul.f32 0.5, %v720_v44 }
 0x2ac   :  { %v769_v36 = vmul.f32 0.125, %v768_v17 }
 0x2ad   :  { %v877_v56 = vmul.f32 0.5, %v821_v49 }
 0x2ae   :  { %v777_v25 = vmul.f32 %v776_v16, %v769_v36 }
 0x2af   :  { %s1332_s26 = spop %1331 }
 0x2b0   :  { %v866_v45 = vstv %s1332_s26  ;;  %s1334_s27 = spop %1333  ;;  %v779_v40 = vmul.f32 0.5, %v777_v25 }
 0x2b1   :  { %v867_v47 = vmul.f32 4.0, %v866_v45  ;;  %s1336_s28 = spop %1335  ;;  %v919_v30 = vstv %s1334_s27 }
 0x2b2   :  { %v965_v33 = vstv %s1336_s28  ;;  %v920_v54 = vmul.f32 0.125, %v919_v30  ;;  %v780_v55 = vadd.f32 %v779_v40, %v778_v51 }
 0x2b3   :  { %v868_v39 = vmul.f32 0.125, %v867_v47  ;;  %v966_v50 = vmul.f32 4.0, %v965_v33 }
 0x2b4   :  { %v976_v60 = vmul.f32 0.5, %v920_v54  ;;  %v980_v31 = vsel %vm979_vm15, %v780_v55, 0.0 }
 0x2b5   :  { %v876_v53 = vmul.f32 %v875_v48, %v868_v39  ;;  %v967_v26 = vmul.f32 0.125, %v966_v50 }
 0x2b7   :  { %v878_v57 = vmul.f32 0.5, %v876_v53  ;;  %v975_v58 = vmul.f32 %v974_v52, %v967_v26 }
 0x2b9   :  { %v879_v59 = vadd.f32 %v878_v57, %v877_v56  ;;  %v977_v61 = vmul.f32 0.5, %v975_v58 }
 0x2bb   :  { %v978_v62 = vadd.f32 %v977_v61, %v976_v60  ;;  %v982_v27 = vsel %vm981_vm0, %v879_v59, %v980_v31 }
 0x2bd   :  { %v984_v42 = vsel %vm983_vm1, %v978_v62, %v982_v27 }
 0x2be   :  { %985 = vst [vmem:[#allocation3] sm:$0x1] %v984_v42 }
 0x2bf   :  { %996 = dma.vmem_to_hbm [thread:$0]  %s992_s30, 16, %s994_s9, [#allocation4]  }
 0x2c0   :  { %1422 = dma.done.wait [#allocation4], 16  }
 0x2c1   :  { %1423 = vsyncadd [#allocation4], 4294967280 }
 0x2c2   :  { %1001 = vsyncpa [#allocation4], 1 }

</bundles_post_ra>
